<compile_context>
chip_gen: v5e
topology: v5e:2x2
jax: 0.10.0
libtpu: 0.0.40
codegen_flags: <defaults>
</compile_context>

<pallas_src>
import functools

import jax
import jax.numpy as jnp
from jax.experimental import pallas as pl
from jax.experimental.pallas import tpu as pltpu


def _round_up(x, m):
    return ((x + m - 1) // m) * m


# ---------------- fused conv + bias + IF neuron + time-average --------------

def _fused_spiking_block_kernel(patch_ref, w_ref, b_ref, spk_ref, avg_ref,
                                v_ref, *, inv_t):
    """One (spatial-tile, timestep) grid step.

    patch_ref : (TM, K)     im2col patches for this tile / timestep
    w_ref     : (K, Cout)   conv weights (resident across the grid)
    b_ref     : (1, Cout)   bias (f32, resident)
    spk_ref   : (TM, Cout)  binary spikes for this tile / timestep (bf16)
    avg_ref   : (TM, Cout)  time-averaged spikes (f32, revisited across T)
    v_ref     : (TM, Cout)  membrane-potential scratch (f32, carried across T)
    """
    t = pl.program_id(1)

    @pl.when(t == 0)
    def _():
        v_ref[...] = jnp.zeros_like(v_ref)
        avg_ref[...] = jnp.zeros_like(avg_ref)

    psum = jnp.dot(patch_ref[...], w_ref[...],
                   preferred_element_type=jnp.float32) + b_ref[...]
    v = v_ref[...] + psum
    s = (v >= 1.0).astype(jnp.float32)      # IF threshold 1.0
    v_ref[...] = v - s                      # soft reset
    spk_ref[...] = s.astype(spk_ref.dtype)  # bf16 storage (spikes are 0/1)

    acc = avg_ref[...] + s
    is_last = t == pl.num_programs(1) - 1
    avg_ref[...] = jnp.where(is_last, acc * inv_t, acc)


def _tile_and_pad(m):
    """Pick the spatial row tile; returns (tile, padded_m)."""
    for t in (1024, 512, 256, 128):
        if m % t == 0:
            return t, m
    if m <= 1024:
        mp = _round_up(m, 8)          # tiny layers: keep sublane alignment
        return mp, mp
    mp = _round_up(m, 512)            # large unaligned M: pad to tile multiple
    return 512, mp


def _im2col_nhwc(x, K, stride, padding):
    """x: (N, H, W, C) -> patches (N, Ho, Wo, K*K*C) with (kh, kw, c) tap order."""
    N, H, W, C = x.shape
    Ho = (H + 2 * padding - K) // stride + 1
    Wo = (W + 2 * padding - K) // stride + 1
    if K == 1 and stride == 1 and padding == 0:
        return x, Ho, Wo              # 1x1 conv: patches == activations (free)
    xp = x
    if padding:
        xp = jnp.pad(x, ((0, 0), (padding, padding), (padding, padding), (0, 0)))
    taps = []
    for kh in range(K):
        for kw in range(K):
            taps.append(xp[:, kh:kh + stride * Ho:stride,
                           kw:kw + stride * Wo:stride, :])
    return jnp.concatenate(taps, axis=-1), Ho, Wo


def spiking_block(x, w, b, stride=1, padding=0):
    """SpikingBlock stub: per-timestep Conv2d + bias, then multi-step IF neuron.

    x: (T, B, H, W, Cin) NHWC activations (f32 input or bf16 spikes)
    w: (Cout, Cin, K, K) PyTorch conv weight;  b: (Cout,)
    returns (spikes (T, B, Ho, Wo, Cout) bf16, time_avg (B, Ho, Wo, Cout) f32)
    """
    T, B, H, W, Cin = x.shape
    Cout, _, K, _ = w.shape
    patches, Ho, Wo = _im2col_nhwc(x.reshape(T * B, H, W, Cin), K, stride, padding)
    M = B * Ho * Wo
    Kdim = Cin * K * K
    patches = patches.reshape(T, M, Kdim)

    # (kh, kw, cin) tap order to match the NHWC im2col columns.
    wmat = jnp.transpose(w, (2, 3, 1, 0)).reshape(Kdim, Cout).astype(patches.dtype)
    bias = b.reshape(1, Cout).astype(jnp.float32)

    tm, Mp = _tile_and_pad(M)
    if Mp != M:
        patches = jnp.pad(patches, ((0, 0), (0, Mp - M), (0, 0)))

    spikes, avg = pl.pallas_call(
        functools.partial(_fused_spiking_block_kernel, inv_t=1.0 / T),
        out_shape=(jax.ShapeDtypeStruct((T, Mp, Cout), jnp.bfloat16),
                   jax.ShapeDtypeStruct((Mp, Cout), jnp.float32)),
        grid=(Mp // tm, T),
        in_specs=[
            pl.BlockSpec((None, tm, Kdim), lambda i, t: (t, i, 0)),
            pl.BlockSpec((Kdim, Cout), lambda i, t: (0, 0)),
            pl.BlockSpec((1, Cout), lambda i, t: (0, 0)),
        ],
        out_specs=(
            pl.BlockSpec((None, tm, Cout), lambda i, t: (t, i, 0)),
            pl.BlockSpec((tm, Cout), lambda i, t: (i, 0)),
        ),
        scratch_shapes=[pltpu.VMEM((tm, Cout), jnp.float32)],
        compiler_params=pltpu.CompilerParams(
            dimension_semantics=("parallel", "arbitrary")),
    )(patches, wmat, bias)

    if Mp != M:
        spikes = spikes[:, :M]
        avg = avg[:M]
    spikes = spikes.reshape(T, B, Ho, Wo, Cout)
    avg = avg.reshape(B, Ho, Wo, Cout)
    return spikes, avg


# ------------------------------- forward pass -------------------------------

def detection_backbone_forward(x, params, fusion=False):
    """x: (B, T, C, H, W) float32 -> list of detection feature maps.

    fusion=False: each entry is the time-averaged map, (B, C, H, W) f32.
    fusion=True : each entry is the spike train, (B, T, C, H, W) f32.
    """
    # (B, T, C, H, W) -> (T, B, H, W, C): NHWC spike-train layout used internally.
    h = jnp.transpose(x, (1, 0, 3, 4, 2))
    detection_feed = []
    spike_feeds = []
    for (w, b, stride, pad) in params["backbone"]:
        h, avg = spiking_block(h, w, b, stride=stride, padding=pad)
        if fusion:
            spike_feeds.append(h)
        else:
            detection_feed.append(jnp.transpose(avg, (0, 3, 1, 2)))
    if fusion:
        detection_feed = [jnp.transpose(fm, (1, 0, 4, 2, 3)).astype(jnp.float32)
                          for fm in spike_feeds]
    x_last = h
    for block in params["extras"]:
        for (w, b, stride, pad) in block:
            x_last, avg = spiking_block(x_last, w, b, stride=stride, padding=pad)
        if fusion:
            detection_feed.append(
                jnp.transpose(x_last, (1, 0, 4, 2, 3)).astype(jnp.float32))
        else:
            detection_feed.append(jnp.transpose(avg, (0, 3, 1, 2)))
    return detection_feed


def make_conv_params(key, c_in, c_out, k):
    kw, kb = jax.random.split(key)
    scale = (2.0 / (c_in * k * k)) ** 0.5
    w = scale * jax.random.normal(kw, (c_out, c_in, k, k), jnp.float32)
    b = 0.05 * jax.random.normal(kb, (c_out,), jnp.float32)
    return w, b


if __name__ == "__main__":
    key = jax.random.PRNGKey(0)
    B, T, C, H, W = 2, 4, 4, 16, 16
    backbone_channels = [8, 16]            # model.out_channels
    extras_fm = [16, 16, 16]               # args.extras
    kx, *ks = jax.random.split(key, 10)

    x = jax.random.normal(kx, (B, T, C, H, W), jnp.float32)

    # Stubbed backbone: two strided SpikingBlocks producing two feature maps.
    backbone = [
        (*make_conv_params(ks[0], C, backbone_channels[0], 3), 2, 1),
        (*make_conv_params(ks[1], backbone_channels[0], backbone_channels[1], 3), 2, 1),
    ]
    c_last = backbone_channels[-1]
    # extras (fusion=False branch of __init__): three Sequential(1x1, 3x3 s2) blocks.
    extras = [
        [(*make_conv_params(ks[2], c_last, c_last // 2, 1), 1, 0),
         (*make_conv_params(ks[3], c_last // 2, extras_fm[0], 3), 2, 1)],
        [(*make_conv_params(ks[4], extras_fm[0], extras_fm[0] // 4, 1), 1, 0),
         (*make_conv_params(ks[5], extras_fm[0] // 4, extras_fm[1], 3), 2, 1)],
        [(*make_conv_params(ks[6], extras_fm[1], extras_fm[1] // 2, 1), 1, 0),
         (*make_conv_params(ks[7], extras_fm[1] // 2, extras_fm[2], 3), 2, 1)],
    ]
    params = {"backbone": backbone, "extras": extras}

    fwd = jax.jit(lambda inp: detection_backbone_forward(inp, params, fusion=False))
    feeds = fwd(x)
    feeds = jax.block_until_ready(feeds)

    expected = [(B, 8, 8, 8), (B, 16, 4, 4), (B, 16, 2, 2), (B, 16, 1, 1), (B, 16, 1, 1)]
    got = [tuple(f.shape) for f in feeds]
    assert got == expected, (got, expected)
    assert all(jnp.isfinite(f).all() for f in feeds)
    print("KERNEL_OK")
</pallas_src>

<mosaic_0001>
module attributes {stable_mosaic.version = 11 : i64} {
  func.func @_fused_spiking_block_kernel(%arg0: i32, %arg1: i32, %arg2: memref<1x128x36xf32, #tpu.memory_space<vmem>>, %arg3: memref<36x8xf32, #tpu.memory_space<vmem>>, %arg4: memref<1x8xf32, #tpu.memory_space<vmem>>, %arg5: memref<1x128x8xbf16, #tpu.memory_space<vmem>>, %arg6: memref<128x8xf32, #tpu.memory_space<vmem>>, %arg7: memref<128x8xf32, #tpu.memory_space<vmem>>) attributes {dimension_semantics = [#tpu.dimension_semantics<parallel>, #tpu.dimension_semantics<arbitrary>], iteration_bounds = array<i64: 1, 4>, scalar_prefetch = 0 : i64, scratch_operands = 1 : i64, tpu.core_type = #tpu.core_type<tc>, window_params = [{transform_indices = @transform_0, window_bounds = array<i64: 1, 128, 36>}, {pipeline_mode = #tpu.pipeline_mode<synchronous>, transform_indices = @transform_1, window_bounds = array<i64: 36, 8>}, {pipeline_mode = #tpu.pipeline_mode<synchronous>, transform_indices = @transform_2, window_bounds = array<i64: 1, 8>}, {transform_indices = @transform_3, window_bounds = array<i64: 1, 128, 8>}, {transform_indices = @transform_4, window_bounds = array<i64: 128, 8>}]} {
    %c0_i32 = arith.constant 0 : i32
    %0 = arith.cmpi eq, %arg1, %c0_i32 : i32
    %1 = arith.extui %0 : i1 to i32
    %c0_i32_0 = arith.constant 0 : i32
    %2 = arith.cmpi ne, %1, %c0_i32_0 : i32
    scf.if %2 {
      %cst_20 = arith.constant 0.000000e+00 : f32
      %29 = vector.broadcast %cst_20 : f32 to vector<128x8xf32>
      %c0_21 = arith.constant 0 : index
      %c0_22 = arith.constant 0 : index
      %30 = vector.load %arg7[%c0_21, %c0_22] : memref<128x8xf32, #tpu.memory_space<vmem>>, vector<128x8xf32>
      tpu.vector_store %arg7[%c0_21, %c0_22], %29 {strides = array<i32>} : memref<128x8xf32, #tpu.memory_space<vmem>>, vector<128x8xf32>,
      %cst_23 = arith.constant 0.000000e+00 : f32
      %31 = vector.broadcast %cst_23 : f32 to vector<128x8xf32>
      %c0_24 = arith.constant 0 : index
      %c0_25 = arith.constant 0 : index
      %32 = vector.load %arg6[%c0_24, %c0_25] : memref<128x8xf32, #tpu.memory_space<vmem>>, vector<128x8xf32>
      tpu.vector_store %arg6[%c0_24, %c0_25], %31 {strides = array<i32>} : memref<128x8xf32, #tpu.memory_space<vmem>>, vector<128x8xf32>,
    } else {
    }
    %c0 = arith.constant 0 : index
    %c0_1 = arith.constant 0 : index
    %c0_2 = arith.constant 0 : index
    %3 = vector.load %arg2[%c0, %c0_1, %c0_2] : memref<1x128x36xf32, #tpu.memory_space<vmem>>, vector<1x128x36xf32>
    %4 = vector.shape_cast %3 : vector<1x128x36xf32> to vector<128x36xf32>
    %c0_3 = arith.constant 0 : index
    %c0_4 = arith.constant 0 : index
    %5 = vector.load %arg3[%c0_3, %c0_4] : memref<36x8xf32, #tpu.memory_space<vmem>>, vector<36x8xf32>
    %cst = arith.constant dense<0.000000e+00> : vector<128x8xf32>
    %6 = tpu.matmul %4, %5, %cst {dimension_numbers = #tpu.dot_dimension_numbers<[1], [0], [0], [1], [0, 0, 1, 1], [], []>} : vector<128x36xf32>, vector<36x8xf32>, vector<128x8xf32> -> vector<128x8xf32>
    %c0_5 = arith.constant 0 : index
    %c0_6 = arith.constant 0 : index
    %7 = vector.load %arg4[%c0_5, %c0_6] : memref<1x8xf32, #tpu.memory_space<vmem>>, vector<1x8xf32>
    %8 = vector.broadcast %7 : vector<1x8xf32> to vector<128x8xf32>
    %9 = arith.addf %6, %8 : vector<128x8xf32>
    %c0_7 = arith.constant 0 : index
    %c0_8 = arith.constant 0 : index
    %10 = vector.load %arg7[%c0_7, %c0_8] : memref<128x8xf32, #tpu.memory_space<vmem>>, vector<128x8xf32>
    %11 = arith.addf %10, %9 : vector<128x8xf32>
    %cst_9 = arith.constant 1.000000e+00 : f32
    %12 = vector.broadcast %cst_9 : f32 to vector<128x8xf32>
    %13 = arith.cmpf oge, %11, %12 : vector<128x8xf32>
    %14 = arith.extui %13 : vector<128x8xi1> to vector<128x8xi32>
    %15 = arith.sitofp %14 : vector<128x8xi32> to vector<128x8xf32>
    %16 = arith.subf %11, %15 : vector<128x8xf32>
    %c0_10 = arith.constant 0 : index
    %c0_11 = arith.constant 0 : index
    %17 = vector.load %arg7[%c0_10, %c0_11] : memref<128x8xf32, #tpu.memory_space<vmem>>, vector<128x8xf32>
    tpu.vector_store %arg7[%c0_10, %c0_11], %16 {strides = array<i32>} : memref<128x8xf32, #tpu.memory_space<vmem>>, vector<128x8xf32>,
    %18 = arith.truncf %15 : vector<128x8xf32> to vector<128x8xbf16>
    %c0_12 = arith.constant 0 : index
    %c0_13 = arith.constant 0 : index
    %c0_14 = arith.constant 0 : index
    %19 = vector.load %arg5[%c0_12, %c0_13, %c0_14] : memref<1x128x8xbf16, #tpu.memory_space<vmem>>, vector<1x128x8xbf16>
    %20 = vector.shape_cast %19 : vector<1x128x8xbf16> to vector<128x8xbf16>
    %21 = vector.shape_cast %18 : vector<128x8xbf16> to vector<1x128x8xbf16>
    tpu.vector_store %arg5[%c0_12, %c0_13, %c0_14], %21 {strides = array<i32>} : memref<1x128x8xbf16, #tpu.memory_space<vmem>>, vector<1x128x8xbf16>,
    %c0_15 = arith.constant 0 : index
    %c0_16 = arith.constant 0 : index
    %22 = vector.load %arg6[%c0_15, %c0_16] : memref<128x8xf32, #tpu.memory_space<vmem>>, vector<128x8xf32>
    %23 = arith.addf %22, %15 : vector<128x8xf32>
    %c3_i32 = arith.constant 3 : i32
    %24 = arith.cmpi eq, %arg1, %c3_i32 : i32
    %cst_17 = arith.constant 2.500000e-01 : f32
    %25 = vector.broadcast %cst_17 : f32 to vector<128x8xf32>
    %26 = arith.mulf %23, %25 : vector<128x8xf32>
    %27 = arith.select %24, %26, %23 : vector<128x8xf32>
    %c0_18 = arith.constant 0 : index
    %c0_19 = arith.constant 0 : index
    %28 = vector.load %arg6[%c0_18, %c0_19] : memref<128x8xf32, #tpu.memory_space<vmem>>, vector<128x8xf32>
    tpu.vector_store %arg6[%c0_18, %c0_19], %27 {strides = array<i32>} : memref<128x8xf32, #tpu.memory_space<vmem>>, vector<128x8xf32>,
    return
  }
  func.func @transform_0(%arg0: i32, %arg1: i32) -> (i32, i32, i32) {
    %c0_i32 = arith.constant 0 : i32
    %c0_i32_0 = arith.constant 0 : i32
    return %arg1, %arg0, %c0_i32 : i32, i32, i32
  }
  func.func @transform_1(%arg0: i32, %arg1: i32) -> (i32, i32) {
    %c0_i32 = arith.constant 0 : i32
    %c0_i32_0 = arith.constant 0 : i32
    %c0_i32_1 = arith.constant 0 : i32
    return %c0_i32, %c0_i32_0 : i32, i32
  }
  func.func @transform_2(%arg0: i32, %arg1: i32) -> (i32, i32) {
    %c0_i32 = arith.constant 0 : i32
    %c0_i32_0 = arith.constant 0 : i32
    %c0_i32_1 = arith.constant 0 : i32
    return %c0_i32, %c0_i32_0 : i32, i32
  }
  func.func @transform_3(%arg0: i32, %arg1: i32) -> (i32, i32, i32) {
    %c0_i32 = arith.constant 0 : i32
    %c0_i32_0 = arith.constant 0 : i32
    return %arg1, %arg0, %c0_i32 : i32, i32, i32
  }
  func.func @transform_4(%arg0: i32, %arg1: i32) -> (i32, i32) {
    %c0_i32 = arith.constant 0 : i32
    %c0_i32_0 = arith.constant 0 : i32
    return %arg0, %c0_i32 : i32, i32
  }
}

module attributes {stable_mosaic.version = 11 : i64} {
  func.func @_fused_spiking_block_kernel(%arg0: i32, %arg1: i32, %arg2: memref<1x32x72xbf16, #tpu.memory_space<vmem>>, %arg3: memref<72x16xbf16, #tpu.memory_space<vmem>>, %arg4: memref<1x16xf32, #tpu.memory_space<vmem>>, %arg5: memref<1x32x16xbf16, #tpu.memory_space<vmem>>, %arg6: memref<32x16xf32, #tpu.memory_space<vmem>>, %arg7: memref<32x16xf32, #tpu.memory_space<vmem>>) attributes {dimension_semantics = [#tpu.dimension_semantics<parallel>, #tpu.dimension_semantics<arbitrary>], iteration_bounds = array<i64: 1, 4>, scalar_prefetch = 0 : i64, scratch_operands = 1 : i64, tpu.core_type = #tpu.core_type<tc>, window_params = [{transform_indices = @transform_0, window_bounds = array<i64: 1, 32, 72>}, {pipeline_mode = #tpu.pipeline_mode<synchronous>, transform_indices = @transform_1, window_bounds = array<i64: 72, 16>}, {pipeline_mode = #tpu.pipeline_mode<synchronous>, transform_indices = @transform_2, window_bounds = array<i64: 1, 16>}, {transform_indices = @transform_3, window_bounds = array<i64: 1, 32, 16>}, {transform_indices = @transform_4, window_bounds = array<i64: 32, 16>}]} {
    %c0_i32 = arith.constant 0 : i32
    %0 = arith.cmpi eq, %arg1, %c0_i32 : i32
    %1 = arith.extui %0 : i1 to i32
    %c0_i32_0 = arith.constant 0 : i32
    %2 = arith.cmpi ne, %1, %c0_i32_0 : i32
    scf.if %2 {
      %cst_20 = arith.constant 0.000000e+00 : f32
      %29 = vector.broadcast %cst_20 : f32 to vector<32x16xf32>
      %c0_21 = arith.constant 0 : index
      %c0_22 = arith.constant 0 : index
      %30 = vector.load %arg7[%c0_21, %c0_22] : memref<32x16xf32, #tpu.memory_space<vmem>>, vector<32x16xf32>
      tpu.vector_store %arg7[%c0_21, %c0_22], %29 {strides = array<i32>} : memref<32x16xf32, #tpu.memory_space<vmem>>, vector<32x16xf32>,
      %cst_23 = arith.constant 0.000000e+00 : f32
      %31 = vector.broadcast %cst_23 : f32 to vector<32x16xf32>
      %c0_24 = arith.constant 0 : index
      %c0_25 = arith.constant 0 : index
      %32 = vector.load %arg6[%c0_24, %c0_25] : memref<32x16xf32, #tpu.memory_space<vmem>>, vector<32x16xf32>
      tpu.vector_store %arg6[%c0_24, %c0_25], %31 {strides = array<i32>} : memref<32x16xf32, #tpu.memory_space<vmem>>, vector<32x16xf32>,
    } else {
    }
    %c0 = arith.constant 0 : index
    %c0_1 = arith.constant 0 : index
    %c0_2 = arith.constant 0 : index
    %3 = vector.load %arg2[%c0, %c0_1, %c0_2] : memref<1x32x72xbf16, #tpu.memory_space<vmem>>, vector<1x32x72xbf16>
    %4 = vector.shape_cast %3 : vector<1x32x72xbf16> to vector<32x72xbf16>
    %c0_3 = arith.constant 0 : index
    %c0_4 = arith.constant 0 : index
    %5 = vector.load %arg3[%c0_3, %c0_4] : memref<72x16xbf16, #tpu.memory_space<vmem>>, vector<72x16xbf16>
    %cst = arith.constant dense<0.000000e+00> : vector<32x16xf32>
    %6 = tpu.matmul %4, %5, %cst {dimension_numbers = #tpu.dot_dimension_numbers<[1], [0], [0], [1], [0, 0, 1, 1], [], []>} : vector<32x72xbf16>, vector<72x16xbf16>, vector<32x16xf32> -> vector<32x16xf32>
    %c0_5 = arith.constant 0 : index
    %c0_6 = arith.constant 0 : index
    %7 = vector.load %arg4[%c0_5, %c0_6] : memref<1x16xf32, #tpu.memory_space<vmem>>, vector<1x16xf32>
    %8 = vector.broadcast %7 : vector<1x16xf32> to vector<32x16xf32>
    %9 = arith.addf %6, %8 : vector<32x16xf32>
    %c0_7 = arith.constant 0 : index
    %c0_8 = arith.constant 0 : index
    %10 = vector.load %arg7[%c0_7, %c0_8] : memref<32x16xf32, #tpu.memory_space<vmem>>, vector<32x16xf32>
    %11 = arith.addf %10, %9 : vector<32x16xf32>
    %cst_9 = arith.constant 1.000000e+00 : f32
    %12 = vector.broadcast %cst_9 : f32 to vector<32x16xf32>
    %13 = arith.cmpf oge, %11, %12 : vector<32x16xf32>
    %14 = arith.extui %13 : vector<32x16xi1> to vector<32x16xi32>
    %15 = arith.sitofp %14 : vector<32x16xi32> to vector<32x16xf32>
    %16 = arith.subf %11, %15 : vector<32x16xf32>
    %c0_10 = arith.constant 0 : index
    %c0_11 = arith.constant 0 : index
    %17 = vector.load %arg7[%c0_10, %c0_11] : memref<32x16xf32, #tpu.memory_space<vmem>>, vector<32x16xf32>
    tpu.vector_store %arg7[%c0_10, %c0_11], %16 {strides = array<i32>} : memref<32x16xf32, #tpu.memory_space<vmem>>, vector<32x16xf32>,
    %18 = arith.truncf %15 : vector<32x16xf32> to vector<32x16xbf16>
    %c0_12 = arith.constant 0 : index
    %c0_13 = arith.constant 0 : index
    %c0_14 = arith.constant 0 : index
    %19 = vector.load %arg5[%c0_12, %c0_13, %c0_14] : memref<1x32x16xbf16, #tpu.memory_space<vmem>>, vector<1x32x16xbf16>
    %20 = vector.shape_cast %19 : vector<1x32x16xbf16> to vector<32x16xbf16>
    %21 = vector.shape_cast %18 : vector<32x16xbf16> to vector<1x32x16xbf16>
    tpu.vector_store %arg5[%c0_12, %c0_13, %c0_14], %21 {strides = array<i32>} : memref<1x32x16xbf16, #tpu.memory_space<vmem>>, vector<1x32x16xbf16>,
    %c0_15 = arith.constant 0 : index
    %c0_16 = arith.constant 0 : index
    %22 = vector.load %arg6[%c0_15, %c0_16] : memref<32x16xf32, #tpu.memory_space<vmem>>, vector<32x16xf32>
    %23 = arith.addf %22, %15 : vector<32x16xf32>
    %c3_i32 = arith.constant 3 : i32
    %24 = arith.cmpi eq, %arg1, %c3_i32 : i32
    %cst_17 = arith.constant 2.500000e-01 : f32
    %25 = vector.broadcast %cst_17 : f32 to vector<32x16xf32>
    %26 = arith.mulf %23, %25 : vector<32x16xf32>
    %27 = arith.select %24, %26, %23 : vector<32x16xf32>
    %c0_18 = arith.constant 0 : index
    %c0_19 = arith.constant 0 : index
    %28 = vector.load %arg6[%c0_18, %c0_19] : memref<32x16xf32, #tpu.memory_space<vmem>>, vector<32x16xf32>
    tpu.vector_store %arg6[%c0_18, %c0_19], %27 {strides = array<i32>} : memref<32x16xf32, #tpu.memory_space<vmem>>, vector<32x16xf32>,
    return
  }
  func.func @transform_0(%arg0: i32, %arg1: i32) -> (i32, i32, i32) {
    %c0_i32 = arith.constant 0 : i32
    %c0_i32_0 = arith.constant 0 : i32
    return %arg1, %arg0, %c0_i32 : i32, i32, i32
  }
  func.func @transform_1(%arg0: i32, %arg1: i32) -> (i32, i32) {
    %c0_i32 = arith.constant 0 : i32
    %c0_i32_0 = arith.constant 0 : i32
    %c0_i32_1 = arith.constant 0 : i32
    return %c0_i32, %c0_i32_0 : i32, i32
  }
  func.func @transform_2(%arg0: i32, %arg1: i32) -> (i32, i32) {
    %c0_i32 = arith.constant 0 : i32
    %c0_i32_0 = arith.constant 0 : i32
    %c0_i32_1 = arith.constant 0 : i32
    return %c0_i32, %c0_i32_0 : i32, i32
  }
  func.func @transform_3(%arg0: i32, %arg1: i32) -> (i32, i32, i32) {
    %c0_i32 = arith.constant 0 : i32
    %c0_i32_0 = arith.constant 0 : i32
    return %arg1, %arg0, %c0_i32 : i32, i32, i32
  }
  func.func @transform_4(%arg0: i32, %arg1: i32) -> (i32, i32) {
    %c0_i32 = arith.constant 0 : i32
    %c0_i32_0 = arith.constant 0 : i32
    return %arg0, %c0_i32 : i32, i32
  }
}

module attributes {stable_mosaic.version = 11 : i64} {
  func.func @_fused_spiking_block_kernel(%arg0: i32, %arg1: i32, %arg2: memref<1x32x16xbf16, #tpu.memory_space<vmem>>, %arg3: memref<16x8xbf16, #tpu.memory_space<vmem>>, %arg4: memref<1x8xf32, #tpu.memory_space<vmem>>, %arg5: memref<1x32x8xbf16, #tpu.memory_space<vmem>>, %arg6: memref<32x8xf32, #tpu.memory_space<vmem>>, %arg7: memref<32x8xf32, #tpu.memory_space<vmem>>) attributes {dimension_semantics = [#tpu.dimension_semantics<parallel>, #tpu.dimension_semantics<arbitrary>], iteration_bounds = array<i64: 1, 4>, scalar_prefetch = 0 : i64, scratch_operands = 1 : i64, tpu.core_type = #tpu.core_type<tc>, window_params = [{transform_indices = @transform_0, window_bounds = array<i64: 1, 32, 16>}, {pipeline_mode = #tpu.pipeline_mode<synchronous>, transform_indices = @transform_1, window_bounds = array<i64: 16, 8>}, {pipeline_mode = #tpu.pipeline_mode<synchronous>, transform_indices = @transform_2, window_bounds = array<i64: 1, 8>}, {transform_indices = @transform_3, window_bounds = array<i64: 1, 32, 8>}, {transform_indices = @transform_4, window_bounds = array<i64: 32, 8>}]} {
    %c0_i32 = arith.constant 0 : i32
    %0 = arith.cmpi eq, %arg1, %c0_i32 : i32
    %1 = arith.extui %0 : i1 to i32
    %c0_i32_0 = arith.constant 0 : i32
    %2 = arith.cmpi ne, %1, %c0_i32_0 : i32
    scf.if %2 {
      %cst_20 = arith.constant 0.000000e+00 : f32
      %29 = vector.broadcast %cst_20 : f32 to vector<32x8xf32>
      %c0_21 = arith.constant 0 : index
      %c0_22 = arith.constant 0 : index
      %30 = vector.load %arg7[%c0_21, %c0_22] : memref<32x8xf32, #tpu.memory_space<vmem>>, vector<32x8xf32>
      tpu.vector_store %arg7[%c0_21, %c0_22], %29 {strides = array<i32>} : memref<32x8xf32, #tpu.memory_space<vmem>>, vector<32x8xf32>,
      %cst_23 = arith.constant 0.000000e+00 : f32
      %31 = vector.broadcast %cst_23 : f32 to vector<32x8xf32>
      %c0_24 = arith.constant 0 : index
      %c0_25 = arith.constant 0 : index
      %32 = vector.load %arg6[%c0_24, %c0_25] : memref<32x8xf32, #tpu.memory_space<vmem>>, vector<32x8xf32>
      tpu.vector_store %arg6[%c0_24, %c0_25], %31 {strides = array<i32>} : memref<32x8xf32, #tpu.memory_space<vmem>>, vector<32x8xf32>,
    } else {
    }
    %c0 = arith.constant 0 : index
    %c0_1 = arith.constant 0 : index
    %c0_2 = arith.constant 0 : index
    %3 = vector.load %arg2[%c0, %c0_1, %c0_2] : memref<1x32x16xbf16, #tpu.memory_space<vmem>>, vector<1x32x16xbf16>
    %4 = vector.shape_cast %3 : vector<1x32x16xbf16> to vector<32x16xbf16>
    %c0_3 = arith.constant 0 : index
    %c0_4 = arith.constant 0 : index
    %5 = vector.load %arg3[%c0_3, %c0_4] : memref<16x8xbf16, #tpu.memory_space<vmem>>, vector<16x8xbf16>
    %cst = arith.constant dense<0.000000e+00> : vector<32x8xf32>
    %6 = tpu.matmul %4, %5, %cst {dimension_numbers = #tpu.dot_dimension_numbers<[1], [0], [0], [1], [0, 0, 1, 1], [], []>} : vector<32x16xbf16>, vector<16x8xbf16>, vector<32x8xf32> -> vector<32x8xf32>
    %c0_5 = arith.constant 0 : index
    %c0_6 = arith.constant 0 : index
    %7 = vector.load %arg4[%c0_5, %c0_6] : memref<1x8xf32, #tpu.memory_space<vmem>>, vector<1x8xf32>
    %8 = vector.broadcast %7 : vector<1x8xf32> to vector<32x8xf32>
    %9 = arith.addf %6, %8 : vector<32x8xf32>
    %c0_7 = arith.constant 0 : index
    %c0_8 = arith.constant 0 : index
    %10 = vector.load %arg7[%c0_7, %c0_8] : memref<32x8xf32, #tpu.memory_space<vmem>>, vector<32x8xf32>
    %11 = arith.addf %10, %9 : vector<32x8xf32>
    %cst_9 = arith.constant 1.000000e+00 : f32
    %12 = vector.broadcast %cst_9 : f32 to vector<32x8xf32>
    %13 = arith.cmpf oge, %11, %12 : vector<32x8xf32>
    %14 = arith.extui %13 : vector<32x8xi1> to vector<32x8xi32>
    %15 = arith.sitofp %14 : vector<32x8xi32> to vector<32x8xf32>
    %16 = arith.subf %11, %15 : vector<32x8xf32>
    %c0_10 = arith.constant 0 : index
    %c0_11 = arith.constant 0 : index
    %17 = vector.load %arg7[%c0_10, %c0_11] : memref<32x8xf32, #tpu.memory_space<vmem>>, vector<32x8xf32>
    tpu.vector_store %arg7[%c0_10, %c0_11], %16 {strides = array<i32>} : memref<32x8xf32, #tpu.memory_space<vmem>>, vector<32x8xf32>,
    %18 = arith.truncf %15 : vector<32x8xf32> to vector<32x8xbf16>
    %c0_12 = arith.constant 0 : index
    %c0_13 = arith.constant 0 : index
    %c0_14 = arith.constant 0 : index
    %19 = vector.load %arg5[%c0_12, %c0_13, %c0_14] : memref<1x32x8xbf16, #tpu.memory_space<vmem>>, vector<1x32x8xbf16>
    %20 = vector.shape_cast %19 : vector<1x32x8xbf16> to vector<32x8xbf16>
    %21 = vector.shape_cast %18 : vector<32x8xbf16> to vector<1x32x8xbf16>
    tpu.vector_store %arg5[%c0_12, %c0_13, %c0_14], %21 {strides = array<i32>} : memref<1x32x8xbf16, #tpu.memory_space<vmem>>, vector<1x32x8xbf16>,
    %c0_15 = arith.constant 0 : index
    %c0_16 = arith.constant 0 : index
    %22 = vector.load %arg6[%c0_15, %c0_16] : memref<32x8xf32, #tpu.memory_space<vmem>>, vector<32x8xf32>
    %23 = arith.addf %22, %15 : vector<32x8xf32>
    %c3_i32 = arith.constant 3 : i32
    %24 = arith.cmpi eq, %arg1, %c3_i32 : i32
    %cst_17 = arith.constant 2.500000e-01 : f32
    %25 = vector.broadcast %cst_17 : f32 to vector<32x8xf32>
    %26 = arith.mulf %23, %25 : vector<32x8xf32>
    %27 = arith.select %24, %26, %23 : vector<32x8xf32>
    %c0_18 = arith.constant 0 : index
    %c0_19 = arith.constant 0 : index
    %28 = vector.load %arg6[%c0_18, %c0_19] : memref<32x8xf32, #tpu.memory_space<vmem>>, vector<32x8xf32>
    tpu.vector_store %arg6[%c0_18, %c0_19], %27 {strides = array<i32>} : memref<32x8xf32, #tpu.memory_space<vmem>>, vector<32x8xf32>,
    return
  }
  func.func @transform_0(%arg0: i32, %arg1: i32) -> (i32, i32, i32) {
    %c0_i32 = arith.constant 0 : i32
    %c0_i32_0 = arith.constant 0 : i32
    return %arg1, %arg0, %c0_i32 : i32, i32, i32
  }
  func.func @transform_1(%arg0: i32, %arg1: i32) -> (i32, i32) {
    %c0_i32 = arith.constant 0 : i32
    %c0_i32_0 = arith.constant 0 : i32
    %c0_i32_1 = arith.constant 0 : i32
    return %c0_i32, %c0_i32_0 : i32, i32
  }
  func.func @transform_2(%arg0: i32, %arg1: i32) -> (i32, i32) {
    %c0_i32 = arith.constant 0 : i32
    %c0_i32_0 = arith.constant 0 : i32
    %c0_i32_1 = arith.constant 0 : i32
    return %c0_i32, %c0_i32_0 : i32, i32
  }
  func.func @transform_3(%arg0: i32, %arg1: i32) -> (i32, i32, i32) {
    %c0_i32 = arith.constant 0 : i32
    %c0_i32_0 = arith.constant 0 : i32
    return %arg1, %arg0, %c0_i32 : i32, i32, i32
  }
  func.func @transform_4(%arg0: i32, %arg1: i32) -> (i32, i32) {
    %c0_i32 = arith.constant 0 : i32
    %c0_i32_0 = arith.constant 0 : i32
    return %arg0, %c0_i32 : i32, i32
  }
}

module attributes {stable_mosaic.version = 11 : i64} {
  func.func @_fused_spiking_block_kernel(%arg0: i32, %arg1: i32, %arg2: memref<1x8x16xbf16, #tpu.memory_space<vmem>>, %arg3: memref<16x4xbf16, #tpu.memory_space<vmem>>, %arg4: memref<1x4xf32, #tpu.memory_space<vmem>>, %arg5: memref<1x8x4xbf16, #tpu.memory_space<vmem>>, %arg6: memref<8x4xf32, #tpu.memory_space<vmem>>, %arg7: memref<8x4xf32, #tpu.memory_space<vmem>>) attributes {dimension_semantics = [#tpu.dimension_semantics<parallel>, #tpu.dimension_semantics<arbitrary>], iteration_bounds = array<i64: 1, 4>, scalar_prefetch = 0 : i64, scratch_operands = 1 : i64, tpu.core_type = #tpu.core_type<tc>, window_params = [{transform_indices = @transform_0, window_bounds = array<i64: 1, 8, 16>}, {pipeline_mode = #tpu.pipeline_mode<synchronous>, transform_indices = @transform_1, window_bounds = array<i64: 16, 4>}, {pipeline_mode = #tpu.pipeline_mode<synchronous>, transform_indices = @transform_2, window_bounds = array<i64: 1, 4>}, {transform_indices = @transform_3, window_bounds = array<i64: 1, 8, 4>}, {transform_indices = @transform_4, window_bounds = array<i64: 8, 4>}]} {
    %c0_i32 = arith.constant 0 : i32
    %0 = arith.cmpi eq, %arg1, %c0_i32 : i32
    %1 = arith.extui %0 : i1 to i32
    %c0_i32_0 = arith.constant 0 : i32
    %2 = arith.cmpi ne, %1, %c0_i32_0 : i32
    scf.if %2 {
      %cst_20 = arith.constant 0.000000e+00 : f32
      %29 = vector.broadcast %cst_20 : f32 to vector<8x4xf32>
      %c0_21 = arith.constant 0 : index
      %c0_22 = arith.constant 0 : index
      %30 = vector.load %arg7[%c0_21, %c0_22] : memref<8x4xf32, #tpu.memory_space<vmem>>, vector<8x4xf32>
      tpu.vector_store %arg7[%c0_21, %c0_22], %29 {strides = array<i32>} : memref<8x4xf32, #tpu.memory_space<vmem>>, vector<8x4xf32>,
      %cst_23 = arith.constant 0.000000e+00 : f32
      %31 = vector.broadcast %cst_23 : f32 to vector<8x4xf32>
      %c0_24 = arith.constant 0 : index
      %c0_25 = arith.constant 0 : index
      %32 = vector.load %arg6[%c0_24, %c0_25] : memref<8x4xf32, #tpu.memory_space<vmem>>, vector<8x4xf32>
      tpu.vector_store %arg6[%c0_24, %c0_25], %31 {strides = array<i32>} : memref<8x4xf32, #tpu.memory_space<vmem>>, vector<8x4xf32>,
    } else {
    }
    %c0 = arith.constant 0 : index
    %c0_1 = arith.constant 0 : index
    %c0_2 = arith.constant 0 : index
    %3 = vector.load %arg2[%c0, %c0_1, %c0_2] : memref<1x8x16xbf16, #tpu.memory_space<vmem>>, vector<1x8x16xbf16>
    %4 = vector.shape_cast %3 : vector<1x8x16xbf16> to vector<8x16xbf16>
    %c0_3 = arith.constant 0 : index
    %c0_4 = arith.constant 0 : index
    %5 = vector.load %arg3[%c0_3, %c0_4] : memref<16x4xbf16, #tpu.memory_space<vmem>>, vector<16x4xbf16>
    %cst = arith.constant dense<0.000000e+00> : vector<8x4xf32>
    %6 = tpu.matmul %4, %5, %cst {dimension_numbers = #tpu.dot_dimension_numbers<[1], [0], [0], [1], [0, 0, 1, 1], [], []>} : vector<8x16xbf16>, vector<16x4xbf16>, vector<8x4xf32> -> vector<8x4xf32>
    %c0_5 = arith.constant 0 : index
    %c0_6 = arith.constant 0 : index
    %7 = vector.load %arg4[%c0_5, %c0_6] : memref<1x4xf32, #tpu.memory_space<vmem>>, vector<1x4xf32>
    %8 = vector.broadcast %7 : vector<1x4xf32> to vector<8x4xf32>
    %9 = arith.addf %6, %8 : vector<8x4xf32>
    %c0_7 = arith.constant 0 : index
    %c0_8 = arith.constant 0 : index
    %10 = vector.load %arg7[%c0_7, %c0_8] : memref<8x4xf32, #tpu.memory_space<vmem>>, vector<8x4xf32>
    %11 = arith.addf %10, %9 : vector<8x4xf32>
    %cst_9 = arith.constant 1.000000e+00 : f32
    %12 = vector.broadcast %cst_9 : f32 to vector<8x4xf32>
    %13 = arith.cmpf oge, %11, %12 : vector<8x4xf32>
    %14 = arith.extui %13 : vector<8x4xi1> to vector<8x4xi32>
    %15 = arith.sitofp %14 : vector<8x4xi32> to vector<8x4xf32>
    %16 = arith.subf %11, %15 : vector<8x4xf32>
    %c0_10 = arith.constant 0 : index
    %c0_11 = arith.constant 0 : index
    %17 = vector.load %arg7[%c0_10, %c0_11] : memref<8x4xf32, #tpu.memory_space<vmem>>, vector<8x4xf32>
    tpu.vector_store %arg7[%c0_10, %c0_11], %16 {strides = array<i32>} : memref<8x4xf32, #tpu.memory_space<vmem>>, vector<8x4xf32>,
    %18 = arith.truncf %15 : vector<8x4xf32> to vector<8x4xbf16>
    %c0_12 = arith.constant 0 : index
    %c0_13 = arith.constant 0 : index
    %c0_14 = arith.constant 0 : index
    %19 = vector.load %arg5[%c0_12, %c0_13, %c0_14] : memref<1x8x4xbf16, #tpu.memory_space<vmem>>, vector<1x8x4xbf16>
    %20 = vector.shape_cast %19 : vector<1x8x4xbf16> to vector<8x4xbf16>
    %21 = vector.shape_cast %18 : vector<8x4xbf16> to vector<1x8x4xbf16>
    tpu.vector_store %arg5[%c0_12, %c0_13, %c0_14], %21 {strides = array<i32>} : memref<1x8x4xbf16, #tpu.memory_space<vmem>>, vector<1x8x4xbf16>,
    %c0_15 = arith.constant 0 : index
    %c0_16 = arith.constant 0 : index
    %22 = vector.load %arg6[%c0_15, %c0_16] : memref<8x4xf32, #tpu.memory_space<vmem>>, vector<8x4xf32>
    %23 = arith.addf %22, %15 : vector<8x4xf32>
    %c3_i32 = arith.constant 3 : i32
    %24 = arith.cmpi eq, %arg1, %c3_i32 : i32
    %cst_17 = arith.constant 2.500000e-01 : f32
    %25 = vector.broadcast %cst_17 : f32 to vector<8x4xf32>
    %26 = arith.mulf %23, %25 : vector<8x4xf32>
    %27 = arith.select %24, %26, %23 : vector<8x4xf32>
    %c0_18 = arith.constant 0 : index
    %c0_19 = arith.constant 0 : index
    %28 = vector.load %arg6[%c0_18, %c0_19] : memref<8x4xf32, #tpu.memory_space<vmem>>, vector<8x4xf32>
    tpu.vector_store %arg6[%c0_18, %c0_19], %27 {strides = array<i32>} : memref<8x4xf32, #tpu.memory_space<vmem>>, vector<8x4xf32>,
    return
  }
  func.func @transform_0(%arg0: i32, %arg1: i32) -> (i32, i32, i32) {
    %c0_i32 = arith.constant 0 : i32
    %c0_i32_0 = arith.constant 0 : i32
    return %arg1, %arg0, %c0_i32 : i32, i32, i32
  }
  func.func @transform_1(%arg0: i32, %arg1: i32) -> (i32, i32) {
    %c0_i32 = arith.constant 0 : i32
    %c0_i32_0 = arith.constant 0 : i32
    %c0_i32_1 = arith.constant 0 : i32
    return %c0_i32, %c0_i32_0 : i32, i32
  }
  func.func @transform_2(%arg0: i32, %arg1: i32) -> (i32, i32) {
    %c0_i32 = arith.constant 0 : i32
    %c0_i32_0 = arith.constant 0 : i32
    %c0_i32_1 = arith.constant 0 : i32
    return %c0_i32, %c0_i32_0 : i32, i32
  }
  func.func @transform_3(%arg0: i32, %arg1: i32) -> (i32, i32, i32) {
    %c0_i32 = arith.constant 0 : i32
    %c0_i32_0 = arith.constant 0 : i32
    return %arg1, %arg0, %c0_i32 : i32, i32, i32
  }
  func.func @transform_4(%arg0: i32, %arg1: i32) -> (i32, i32) {
    %c0_i32 = arith.constant 0 : i32
    %c0_i32_0 = arith.constant 0 : i32
    return %arg0, %c0_i32 : i32, i32
  }
}

module attributes {stable_mosaic.version = 11 : i64} {
  func.func @_fused_spiking_block_kernel(%arg0: i32, %arg1: i32, %arg2: memref<1x8x72xbf16, #tpu.memory_space<vmem>>, %arg3: memref<72x16xbf16, #tpu.memory_space<vmem>>, %arg4: memref<1x16xf32, #tpu.memory_space<vmem>>, %arg5: memref<1x8x16xbf16, #tpu.memory_space<vmem>>, %arg6: memref<8x16xf32, #tpu.memory_space<vmem>>, %arg7: memref<8x16xf32, #tpu.memory_space<vmem>>) attributes {dimension_semantics = [#tpu.dimension_semantics<parallel>, #tpu.dimension_semantics<arbitrary>], iteration_bounds = array<i64: 1, 4>, scalar_prefetch = 0 : i64, scratch_operands = 1 : i64, tpu.core_type = #tpu.core_type<tc>, window_params = [{transform_indices = @transform_0, window_bounds = array<i64: 1, 8, 72>}, {pipeline_mode = #tpu.pipeline_mode<synchronous>, transform_indices = @transform_1, window_bounds = array<i64: 72, 16>}, {pipeline_mode = #tpu.pipeline_mode<synchronous>, transform_indices = @transform_2, window_bounds = array<i64: 1, 16>}, {transform_indices = @transform_3, window_bounds = array<i64: 1, 8, 16>}, {transform_indices = @transform_4, window_bounds = array<i64: 8, 16>}]} {
    %c0_i32 = arith.constant 0 : i32
    %0 = arith.cmpi eq, %arg1, %c0_i32 : i32
    %1 = arith.extui %0 : i1 to i32
    %c0_i32_0 = arith.constant 0 : i32
    %2 = arith.cmpi ne, %1, %c0_i32_0 : i32
    scf.if %2 {
      %cst_20 = arith.constant 0.000000e+00 : f32
      %29 = vector.broadcast %cst_20 : f32 to vector<8x16xf32>
      %c0_21 = arith.constant 0 : index
      %c0_22 = arith.constant 0 : index
      %30 = vector.load %arg7[%c0_21, %c0_22] : memref<8x16xf32, #tpu.memory_space<vmem>>, vector<8x16xf32>
      tpu.vector_store %arg7[%c0_21, %c0_22], %29 {strides = array<i32>} : memref<8x16xf32, #tpu.memory_space<vmem>>, vector<8x16xf32>,
      %cst_23 = arith.constant 0.000000e+00 : f32
      %31 = vector.broadcast %cst_23 : f32 to vector<8x16xf32>
      %c0_24 = arith.constant 0 : index
      %c0_25 = arith.constant 0 : index
      %32 = vector.load %arg6[%c0_24, %c0_25] : memref<8x16xf32, #tpu.memory_space<vmem>>, vector<8x16xf32>
      tpu.vector_store %arg6[%c0_24, %c0_25], %31 {strides = array<i32>} : memref<8x16xf32, #tpu.memory_space<vmem>>, vector<8x16xf32>,
    } else {
    }
    %c0 = arith.constant 0 : index
    %c0_1 = arith.constant 0 : index
    %c0_2 = arith.constant 0 : index
    %3 = vector.load %arg2[%c0, %c0_1, %c0_2] : memref<1x8x72xbf16, #tpu.memory_space<vmem>>, vector<1x8x72xbf16>
    %4 = vector.shape_cast %3 : vector<1x8x72xbf16> to vector<8x72xbf16>
    %c0_3 = arith.constant 0 : index
    %c0_4 = arith.constant 0 : index
    %5 = vector.load %arg3[%c0_3, %c0_4] : memref<72x16xbf16, #tpu.memory_space<vmem>>, vector<72x16xbf16>
    %cst = arith.constant dense<0.000000e+00> : vector<8x16xf32>
    %6 = tpu.matmul %4, %5, %cst {dimension_numbers = #tpu.dot_dimension_numbers<[1], [0], [0], [1], [0, 0, 1, 1], [], []>} : vector<8x72xbf16>, vector<72x16xbf16>, vector<8x16xf32> -> vector<8x16xf32>
    %c0_5 = arith.constant 0 : index
    %c0_6 = arith.constant 0 : index
    %7 = vector.load %arg4[%c0_5, %c0_6] : memref<1x16xf32, #tpu.memory_space<vmem>>, vector<1x16xf32>
    %8 = vector.broadcast %7 : vector<1x16xf32> to vector<8x16xf32>
    %9 = arith.addf %6, %8 : vector<8x16xf32>
    %c0_7 = arith.constant 0 : index
    %c0_8 = arith.constant 0 : index
    %10 = vector.load %arg7[%c0_7, %c0_8] : memref<8x16xf32, #tpu.memory_space<vmem>>, vector<8x16xf32>
    %11 = arith.addf %10, %9 : vector<8x16xf32>
    %cst_9 = arith.constant 1.000000e+00 : f32
    %12 = vector.broadcast %cst_9 : f32 to vector<8x16xf32>
    %13 = arith.cmpf oge, %11, %12 : vector<8x16xf32>
    %14 = arith.extui %13 : vector<8x16xi1> to vector<8x16xi32>
    %15 = arith.sitofp %14 : vector<8x16xi32> to vector<8x16xf32>
    %16 = arith.subf %11, %15 : vector<8x16xf32>
    %c0_10 = arith.constant 0 : index
    %c0_11 = arith.constant 0 : index
    %17 = vector.load %arg7[%c0_10, %c0_11] : memref<8x16xf32, #tpu.memory_space<vmem>>, vector<8x16xf32>
    tpu.vector_store %arg7[%c0_10, %c0_11], %16 {strides = array<i32>} : memref<8x16xf32, #tpu.memory_space<vmem>>, vector<8x16xf32>,
    %18 = arith.truncf %15 : vector<8x16xf32> to vector<8x16xbf16>
    %c0_12 = arith.constant 0 : index
    %c0_13 = arith.constant 0 : index
    %c0_14 = arith.constant 0 : index
    %19 = vector.load %arg5[%c0_12, %c0_13, %c0_14] : memref<1x8x16xbf16, #tpu.memory_space<vmem>>, vector<1x8x16xbf16>
    %20 = vector.shape_cast %19 : vector<1x8x16xbf16> to vector<8x16xbf16>
    %21 = vector.shape_cast %18 : vector<8x16xbf16> to vector<1x8x16xbf16>
    tpu.vector_store %arg5[%c0_12, %c0_13, %c0_14], %21 {strides = array<i32>} : memref<1x8x16xbf16, #tpu.memory_space<vmem>>, vector<1x8x16xbf16>,
    %c0_15 = arith.constant 0 : index
    %c0_16 = arith.constant 0 : index
    %22 = vector.load %arg6[%c0_15, %c0_16] : memref<8x16xf32, #tpu.memory_space<vmem>>, vector<8x16xf32>
    %23 = arith.addf %22, %15 : vector<8x16xf32>
    %c3_i32 = arith.constant 3 : i32
    %24 = arith.cmpi eq, %arg1, %c3_i32 : i32
    %cst_17 = arith.constant 2.500000e-01 : f32
    %25 = vector.broadcast %cst_17 : f32 to vector<8x16xf32>
    %26 = arith.mulf %23, %25 : vector<8x16xf32>
    %27 = arith.select %24, %26, %23 : vector<8x16xf32>
    %c0_18 = arith.constant 0 : index
    %c0_19 = arith.constant 0 : index
    %28 = vector.load %arg6[%c0_18, %c0_19] : memref<8x16xf32, #tpu.memory_space<vmem>>, vector<8x16xf32>
    tpu.vector_store %arg6[%c0_18, %c0_19], %27 {strides = array<i32>} : memref<8x16xf32, #tpu.memory_space<vmem>>, vector<8x16xf32>,
    return
  }
  func.func @transform_0(%arg0: i32, %arg1: i32) -> (i32, i32, i32) {
    %c0_i32 = arith.constant 0 : i32
    %c0_i32_0 = arith.constant 0 : i32
    return %arg1, %arg0, %c0_i32 : i32, i32, i32
  }
  func.func @transform_1(%arg0: i32, %arg1: i32) -> (i32, i32) {
    %c0_i32 = arith.constant 0 : i32
    %c0_i32_0 = arith.constant 0 : i32
    %c0_i32_1 = arith.constant 0 : i32
    return %c0_i32, %c0_i32_0 : i32, i32
  }
  func.func @transform_2(%arg0: i32, %arg1: i32) -> (i32, i32) {
    %c0_i32 = arith.constant 0 : i32
    %c0_i32_0 = arith.constant 0 : i32
    %c0_i32_1 = arith.constant 0 : i32
    return %c0_i32, %c0_i32_0 : i32, i32
  }
  func.func @transform_3(%arg0: i32, %arg1: i32) -> (i32, i32, i32) {
    %c0_i32 = arith.constant 0 : i32
    %c0_i32_0 = arith.constant 0 : i32
    return %arg1, %arg0, %c0_i32 : i32, i32, i32
  }
  func.func @transform_4(%arg0: i32, %arg1: i32) -> (i32, i32) {
    %c0_i32 = arith.constant 0 : i32
    %c0_i32_0 = arith.constant 0 : i32
    return %arg0, %c0_i32 : i32, i32
  }
}

module attributes {stable_mosaic.version = 11 : i64} {
  func.func @_fused_spiking_block_kernel(%arg0: i32, %arg1: i32, %arg2: memref<1x8x16xbf16, #tpu.memory_space<vmem>>, %arg3: memref<16x8xbf16, #tpu.memory_space<vmem>>, %arg4: memref<1x8xf32, #tpu.memory_space<vmem>>, %arg5: memref<1x8x8xbf16, #tpu.memory_space<vmem>>, %arg6: memref<8x8xf32, #tpu.memory_space<vmem>>, %arg7: memref<8x8xf32, #tpu.memory_space<vmem>>) attributes {dimension_semantics = [#tpu.dimension_semantics<parallel>, #tpu.dimension_semantics<arbitrary>], iteration_bounds = array<i64: 1, 4>, scalar_prefetch = 0 : i64, scratch_operands = 1 : i64, tpu.core_type = #tpu.core_type<tc>, window_params = [{transform_indices = @transform_0, window_bounds = array<i64: 1, 8, 16>}, {pipeline_mode = #tpu.pipeline_mode<synchronous>, transform_indices = @transform_1, window_bounds = array<i64: 16, 8>}, {pipeline_mode = #tpu.pipeline_mode<synchronous>, transform_indices = @transform_2, window_bounds = array<i64: 1, 8>}, {transform_indices = @transform_3, window_bounds = array<i64: 1, 8, 8>}, {transform_indices = @transform_4, window_bounds = array<i64: 8, 8>}]} {
    %c0_i32 = arith.constant 0 : i32
    %0 = arith.cmpi eq, %arg1, %c0_i32 : i32
    %1 = arith.extui %0 : i1 to i32
    %c0_i32_0 = arith.constant 0 : i32
    %2 = arith.cmpi ne, %1, %c0_i32_0 : i32
    scf.if %2 {
      %cst_20 = arith.constant 0.000000e+00 : f32
      %29 = vector.broadcast %cst_20 : f32 to vector<8x8xf32>
      %c0_21 = arith.constant 0 : index
      %c0_22 = arith.constant 0 : index
      %30 = vector.load %arg7[%c0_21, %c0_22] : memref<8x8xf32, #tpu.memory_space<vmem>>, vector<8x8xf32>
      tpu.vector_store %arg7[%c0_21, %c0_22], %29 {strides = array<i32>} : memref<8x8xf32, #tpu.memory_space<vmem>>, vector<8x8xf32>,
      %cst_23 = arith.constant 0.000000e+00 : f32
      %31 = vector.broadcast %cst_23 : f32 to vector<8x8xf32>
      %c0_24 = arith.constant 0 : index
      %c0_25 = arith.constant 0 : index
      %32 = vector.load %arg6[%c0_24, %c0_25] : memref<8x8xf32, #tpu.memory_space<vmem>>, vector<8x8xf32>
      tpu.vector_store %arg6[%c0_24, %c0_25], %31 {strides = array<i32>} : memref<8x8xf32, #tpu.memory_space<vmem>>, vector<8x8xf32>,
    } else {
    }
    %c0 = arith.constant 0 : index
    %c0_1 = arith.constant 0 : index
    %c0_2 = arith.constant 0 : index
    %3 = vector.load %arg2[%c0, %c0_1, %c0_2] : memref<1x8x16xbf16, #tpu.memory_space<vmem>>, vector<1x8x16xbf16>
    %4 = vector.shape_cast %3 : vector<1x8x16xbf16> to vector<8x16xbf16>
    %c0_3 = arith.constant 0 : index
    %c0_4 = arith.constant 0 : index
    %5 = vector.load %arg3[%c0_3, %c0_4] : memref<16x8xbf16, #tpu.memory_space<vmem>>, vector<16x8xbf16>
    %cst = arith.constant dense<0.000000e+00> : vector<8x8xf32>
    %6 = tpu.matmul %4, %5, %cst {dimension_numbers = #tpu.dot_dimension_numbers<[1], [0], [0], [1], [0, 0, 1, 1], [], []>} : vector<8x16xbf16>, vector<16x8xbf16>, vector<8x8xf32> -> vector<8x8xf32>
    %c0_5 = arith.constant 0 : index
    %c0_6 = arith.constant 0 : index
    %7 = vector.load %arg4[%c0_5, %c0_6] : memref<1x8xf32, #tpu.memory_space<vmem>>, vector<1x8xf32>
    %8 = vector.broadcast %7 : vector<1x8xf32> to vector<8x8xf32>
    %9 = arith.addf %6, %8 : vector<8x8xf32>
    %c0_7 = arith.constant 0 : index
    %c0_8 = arith.constant 0 : index
    %10 = vector.load %arg7[%c0_7, %c0_8] : memref<8x8xf32, #tpu.memory_space<vmem>>, vector<8x8xf32>
    %11 = arith.addf %10, %9 : vector<8x8xf32>
    %cst_9 = arith.constant 1.000000e+00 : f32
    %12 = vector.broadcast %cst_9 : f32 to vector<8x8xf32>
    %13 = arith.cmpf oge, %11, %12 : vector<8x8xf32>
    %14 = arith.extui %13 : vector<8x8xi1> to vector<8x8xi32>
    %15 = arith.sitofp %14 : vector<8x8xi32> to vector<8x8xf32>
    %16 = arith.subf %11, %15 : vector<8x8xf32>
    %c0_10 = arith.constant 0 : index
    %c0_11 = arith.constant 0 : index
    %17 = vector.load %arg7[%c0_10, %c0_11] : memref<8x8xf32, #tpu.memory_space<vmem>>, vector<8x8xf32>
    tpu.vector_store %arg7[%c0_10, %c0_11], %16 {strides = array<i32>} : memref<8x8xf32, #tpu.memory_space<vmem>>, vector<8x8xf32>,
    %18 = arith.truncf %15 : vector<8x8xf32> to vector<8x8xbf16>
    %c0_12 = arith.constant 0 : index
    %c0_13 = arith.constant 0 : index
    %c0_14 = arith.constant 0 : index
    %19 = vector.load %arg5[%c0_12, %c0_13, %c0_14] : memref<1x8x8xbf16, #tpu.memory_space<vmem>>, vector<1x8x8xbf16>
    %20 = vector.shape_cast %19 : vector<1x8x8xbf16> to vector<8x8xbf16>
    %21 = vector.shape_cast %18 : vector<8x8xbf16> to vector<1x8x8xbf16>
    tpu.vector_store %arg5[%c0_12, %c0_13, %c0_14], %21 {strides = array<i32>} : memref<1x8x8xbf16, #tpu.memory_space<vmem>>, vector<1x8x8xbf16>,
    %c0_15 = arith.constant 0 : index
    %c0_16 = arith.constant 0 : index
    %22 = vector.load %arg6[%c0_15, %c0_16] : memref<8x8xf32, #tpu.memory_space<vmem>>, vector<8x8xf32>
    %23 = arith.addf %22, %15 : vector<8x8xf32>
    %c3_i32 = arith.constant 3 : i32
    %24 = arith.cmpi eq, %arg1, %c3_i32 : i32
    %cst_17 = arith.constant 2.500000e-01 : f32
    %25 = vector.broadcast %cst_17 : f32 to vector<8x8xf32>
    %26 = arith.mulf %23, %25 : vector<8x8xf32>
    %27 = arith.select %24, %26, %23 : vector<8x8xf32>
    %c0_18 = arith.constant 0 : index
    %c0_19 = arith.constant 0 : index
    %28 = vector.load %arg6[%c0_18, %c0_19] : memref<8x8xf32, #tpu.memory_space<vmem>>, vector<8x8xf32>
    tpu.vector_store %arg6[%c0_18, %c0_19], %27 {strides = array<i32>} : memref<8x8xf32, #tpu.memory_space<vmem>>, vector<8x8xf32>,
    return
  }
  func.func @transform_0(%arg0: i32, %arg1: i32) -> (i32, i32, i32) {
    %c0_i32 = arith.constant 0 : i32
    %c0_i32_0 = arith.constant 0 : i32
    return %arg1, %arg0, %c0_i32 : i32, i32, i32
  }
  func.func @transform_1(%arg0: i32, %arg1: i32) -> (i32, i32) {
    %c0_i32 = arith.constant 0 : i32
    %c0_i32_0 = arith.constant 0 : i32
    %c0_i32_1 = arith.constant 0 : i32
    return %c0_i32, %c0_i32_0 : i32, i32
  }
  func.func @transform_2(%arg0: i32, %arg1: i32) -> (i32, i32) {
    %c0_i32 = arith.constant 0 : i32
    %c0_i32_0 = arith.constant 0 : i32
    %c0_i32_1 = arith.constant 0 : i32
    return %c0_i32, %c0_i32_0 : i32, i32
  }
  func.func @transform_3(%arg0: i32, %arg1: i32) -> (i32, i32, i32) {
    %c0_i32 = arith.constant 0 : i32
    %c0_i32_0 = arith.constant 0 : i32
    return %arg1, %arg0, %c0_i32 : i32, i32, i32
  }
  func.func @transform_4(%arg0: i32, %arg1: i32) -> (i32, i32) {
    %c0_i32 = arith.constant 0 : i32
    %c0_i32_0 = arith.constant 0 : i32
    return %arg0, %c0_i32 : i32, i32
  }
}

module attributes {stable_mosaic.version = 11 : i64} {
  func.func @_fused_spiking_block_kernel(%arg0: i32, %arg1: i32, %arg2: memref<1x8x36xbf16, #tpu.memory_space<vmem>>, %arg3: memref<36x16xbf16, #tpu.memory_space<vmem>>, %arg4: memref<1x16xf32, #tpu.memory_space<vmem>>, %arg5: memref<1x8x16xbf16, #tpu.memory_space<vmem>>, %arg6: memref<8x16xf32, #tpu.memory_space<vmem>>, %arg7: memref<8x16xf32, #tpu.memory_space<vmem>>) attributes {dimension_semantics = [#tpu.dimension_semantics<parallel>, #tpu.dimension_semantics<arbitrary>], iteration_bounds = array<i64: 1, 4>, scalar_prefetch = 0 : i64, scratch_operands = 1 : i64, tpu.core_type = #tpu.core_type<tc>, window_params = [{transform_indices = @transform_0, window_bounds = array<i64: 1, 8, 36>}, {pipeline_mode = #tpu.pipeline_mode<synchronous>, transform_indices = @transform_1, window_bounds = array<i64: 36, 16>}, {pipeline_mode = #tpu.pipeline_mode<synchronous>, transform_indices = @transform_2, window_bounds = array<i64: 1, 16>}, {transform_indices = @transform_3, window_bounds = array<i64: 1, 8, 16>}, {transform_indices = @transform_4, window_bounds = array<i64: 8, 16>}]} {
    %c0_i32 = arith.constant 0 : i32
    %0 = arith.cmpi eq, %arg1, %c0_i32 : i32
    %1 = arith.extui %0 : i1 to i32
    %c0_i32_0 = arith.constant 0 : i32
    %2 = arith.cmpi ne, %1, %c0_i32_0 : i32
    scf.if %2 {
      %cst_20 = arith.constant 0.000000e+00 : f32
      %29 = vector.broadcast %cst_20 : f32 to vector<8x16xf32>
      %c0_21 = arith.constant 0 : index
      %c0_22 = arith.constant 0 : index
      %30 = vector.load %arg7[%c0_21, %c0_22] : memref<8x16xf32, #tpu.memory_space<vmem>>, vector<8x16xf32>
      tpu.vector_store %arg7[%c0_21, %c0_22], %29 {strides = array<i32>} : memref<8x16xf32, #tpu.memory_space<vmem>>, vector<8x16xf32>,
      %cst_23 = arith.constant 0.000000e+00 : f32
      %31 = vector.broadcast %cst_23 : f32 to vector<8x16xf32>
      %c0_24 = arith.constant 0 : index
      %c0_25 = arith.constant 0 : index
      %32 = vector.load %arg6[%c0_24, %c0_25] : memref<8x16xf32, #tpu.memory_space<vmem>>, vector<8x16xf32>
      tpu.vector_store %arg6[%c0_24, %c0_25], %31 {strides = array<i32>} : memref<8x16xf32, #tpu.memory_space<vmem>>, vector<8x16xf32>,
    } else {
    }
    %c0 = arith.constant 0 : index
    %c0_1 = arith.constant 0 : index
    %c0_2 = arith.constant 0 : index
    %3 = vector.load %arg2[%c0, %c0_1, %c0_2] : memref<1x8x36xbf16, #tpu.memory_space<vmem>>, vector<1x8x36xbf16>
    %4 = vector.shape_cast %3 : vector<1x8x36xbf16> to vector<8x36xbf16>
    %c0_3 = arith.constant 0 : index
    %c0_4 = arith.constant 0 : index
    %5 = vector.load %arg3[%c0_3, %c0_4] : memref<36x16xbf16, #tpu.memory_space<vmem>>, vector<36x16xbf16>
    %cst = arith.constant dense<0.000000e+00> : vector<8x16xf32>
    %6 = tpu.matmul %4, %5, %cst {dimension_numbers = #tpu.dot_dimension_numbers<[1], [0], [0], [1], [0, 0, 1, 1], [], []>} : vector<8x36xbf16>, vector<36x16xbf16>, vector<8x16xf32> -> vector<8x16xf32>
    %c0_5 = arith.constant 0 : index
    %c0_6 = arith.constant 0 : index
    %7 = vector.load %arg4[%c0_5, %c0_6] : memref<1x16xf32, #tpu.memory_space<vmem>>, vector<1x16xf32>
    %8 = vector.broadcast %7 : vector<1x16xf32> to vector<8x16xf32>
    %9 = arith.addf %6, %8 : vector<8x16xf32>
    %c0_7 = arith.constant 0 : index
    %c0_8 = arith.constant 0 : index
    %10 = vector.load %arg7[%c0_7, %c0_8] : memref<8x16xf32, #tpu.memory_space<vmem>>, vector<8x16xf32>
    %11 = arith.addf %10, %9 : vector<8x16xf32>
    %cst_9 = arith.constant 1.000000e+00 : f32
    %12 = vector.broadcast %cst_9 : f32 to vector<8x16xf32>
    %13 = arith.cmpf oge, %11, %12 : vector<8x16xf32>
    %14 = arith.extui %13 : vector<8x16xi1> to vector<8x16xi32>
    %15 = arith.sitofp %14 : vector<8x16xi32> to vector<8x16xf32>
    %16 = arith.subf %11, %15 : vector<8x16xf32>
    %c0_10 = arith.constant 0 : index
    %c0_11 = arith.constant 0 : index
    %17 = vector.load %arg7[%c0_10, %c0_11] : memref<8x16xf32, #tpu.memory_space<vmem>>, vector<8x16xf32>
    tpu.vector_store %arg7[%c0_10, %c0_11], %16 {strides = array<i32>} : memref<8x16xf32, #tpu.memory_space<vmem>>, vector<8x16xf32>,
    %18 = arith.truncf %15 : vector<8x16xf32> to vector<8x16xbf16>
    %c0_12 = arith.constant 0 : index
    %c0_13 = arith.constant 0 : index
    %c0_14 = arith.constant 0 : index
    %19 = vector.load %arg5[%c0_12, %c0_13, %c0_14] : memref<1x8x16xbf16, #tpu.memory_space<vmem>>, vector<1x8x16xbf16>
    %20 = vector.shape_cast %19 : vector<1x8x16xbf16> to vector<8x16xbf16>
    %21 = vector.shape_cast %18 : vector<8x16xbf16> to vector<1x8x16xbf16>
    tpu.vector_store %arg5[%c0_12, %c0_13, %c0_14], %21 {strides = array<i32>} : memref<1x8x16xbf16, #tpu.memory_space<vmem>>, vector<1x8x16xbf16>,
    %c0_15 = arith.constant 0 : index
    %c0_16 = arith.constant 0 : index
    %22 = vector.load %arg6[%c0_15, %c0_16] : memref<8x16xf32, #tpu.memory_space<vmem>>, vector<8x16xf32>
    %23 = arith.addf %22, %15 : vector<8x16xf32>
    %c3_i32 = arith.constant 3 : i32
    %24 = arith.cmpi eq, %arg1, %c3_i32 : i32
    %cst_17 = arith.constant 2.500000e-01 : f32
    %25 = vector.broadcast %cst_17 : f32 to vector<8x16xf32>
    %26 = arith.mulf %23, %25 : vector<8x16xf32>
    %27 = arith.select %24, %26, %23 : vector<8x16xf32>
    %c0_18 = arith.constant 0 : index
    %c0_19 = arith.constant 0 : index
    %28 = vector.load %arg6[%c0_18, %c0_19] : memref<8x16xf32, #tpu.memory_space<vmem>>, vector<8x16xf32>
    tpu.vector_store %arg6[%c0_18, %c0_19], %27 {strides = array<i32>} : memref<8x16xf32, #tpu.memory_space<vmem>>, vector<8x16xf32>,
    return
  }
  func.func @transform_0(%arg0: i32, %arg1: i32) -> (i32, i32, i32) {
    %c0_i32 = arith.constant 0 : i32
    %c0_i32_0 = arith.constant 0 : i32
    return %arg1, %arg0, %c0_i32 : i32, i32, i32
  }
  func.func @transform_1(%arg0: i32, %arg1: i32) -> (i32, i32) {
    %c0_i32 = arith.constant 0 : i32
    %c0_i32_0 = arith.constant 0 : i32
    %c0_i32_1 = arith.constant 0 : i32
    return %c0_i32, %c0_i32_0 : i32, i32
  }
  func.func @transform_2(%arg0: i32, %arg1: i32) -> (i32, i32) {
    %c0_i32 = arith.constant 0 : i32
    %c0_i32_0 = arith.constant 0 : i32
    %c0_i32_1 = arith.constant 0 : i32
    return %c0_i32, %c0_i32_0 : i32, i32
  }
  func.func @transform_3(%arg0: i32, %arg1: i32) -> (i32, i32, i32) {
    %c0_i32 = arith.constant 0 : i32
    %c0_i32_0 = arith.constant 0 : i32
    return %arg1, %arg0, %c0_i32 : i32, i32, i32
  }
  func.func @transform_4(%arg0: i32, %arg1: i32) -> (i32, i32) {
    %c0_i32 = arith.constant 0 : i32
    %c0_i32_0 = arith.constant 0 : i32
    return %arg0, %c0_i32 : i32, i32
  }
}

module attributes {stable_mosaic.version = 11 : i64} {
  func.func @_fused_spiking_block_kernel(%arg0: i32, %arg1: i32, %arg2: memref<1x8x72xbf16, #tpu.memory_space<vmem>>, %arg3: memref<72x16xbf16, #tpu.memory_space<vmem>>, %arg4: memref<1x16xf32, #tpu.memory_space<vmem>>, %arg5: memref<1x8x16xbf16, #tpu.memory_space<vmem>>, %arg6: memref<8x16xf32, #tpu.memory_space<vmem>>, %arg7: memref<8x16xf32, #tpu.memory_space<vmem>>) attributes {dimension_semantics = [#tpu.dimension_semantics<parallel>, #tpu.dimension_semantics<arbitrary>], iteration_bounds = array<i64: 1, 4>, scalar_prefetch = 0 : i64, scratch_operands = 1 : i64, tpu.core_type = #tpu.core_type<tc>, window_params = [{transform_indices = @transform_0, window_bounds = array<i64: 1, 8, 72>}, {pipeline_mode = #tpu.pipeline_mode<synchronous>, transform_indices = @transform_1, window_bounds = array<i64: 72, 16>}, {pipeline_mode = #tpu.pipeline_mode<synchronous>, transform_indices = @transform_2, window_bounds = array<i64: 1, 16>}, {transform_indices = @transform_3, window_bounds = array<i64: 1, 8, 16>}, {transform_indices = @transform_4, window_bounds = array<i64: 8, 16>}]} {
    %c0_i32 = arith.constant 0 : i32
    %0 = arith.cmpi eq, %arg1, %c0_i32 : i32
    %1 = arith.extui %0 : i1 to i32
    %c0_i32_0 = arith.constant 0 : i32
    %2 = arith.cmpi ne, %1, %c0_i32_0 : i32
    scf.if %2 {
      %cst_20 = arith.constant 0.000000e+00 : f32
      %29 = vector.broadcast %cst_20 : f32 to vector<8x16xf32>
      %c0_21 = arith.constant 0 : index
      %c0_22 = arith.constant 0 : index
      %30 = vector.load %arg7[%c0_21, %c0_22] : memref<8x16xf32, #tpu.memory_space<vmem>>, vector<8x16xf32>
      tpu.vector_store %arg7[%c0_21, %c0_22], %29 {strides = array<i32>} : memref<8x16xf32, #tpu.memory_space<vmem>>, vector<8x16xf32>,
      %cst_23 = arith.constant 0.000000e+00 : f32
      %31 = vector.broadcast %cst_23 : f32 to vector<8x16xf32>
      %c0_24 = arith.constant 0 : index
      %c0_25 = arith.constant 0 : index
      %32 = vector.load %arg6[%c0_24, %c0_25] : memref<8x16xf32, #tpu.memory_space<vmem>>, vector<8x16xf32>
      tpu.vector_store %arg6[%c0_24, %c0_25], %31 {strides = array<i32>} : memref<8x16xf32, #tpu.memory_space<vmem>>, vector<8x16xf32>,
    } else {
    }
    %c0 = arith.constant 0 : index
    %c0_1 = arith.constant 0 : index
    %c0_2 = arith.constant 0 : index
    %3 = vector.load %arg2[%c0, %c0_1, %c0_2] : memref<1x8x72xbf16, #tpu.memory_space<vmem>>, vector<1x8x72xbf16>
    %4 = vector.shape_cast %3 : vector<1x8x72xbf16> to vector<8x72xbf16>
    %c0_3 = arith.constant 0 : index
    %c0_4 = arith.constant 0 : index
    %5 = vector.load %arg3[%c0_3, %c0_4] : memref<72x16xbf16, #tpu.memory_space<vmem>>, vector<72x16xbf16>
    %cst = arith.constant dense<0.000000e+00> : vector<8x16xf32>
    %6 = tpu.matmul %4, %5, %cst {dimension_numbers = #tpu.dot_dimension_numbers<[1], [0], [0], [1], [0, 0, 1, 1], [], []>} : vector<8x72xbf16>, vector<72x16xbf16>, vector<8x16xf32> -> vector<8x16xf32>
    %c0_5 = arith.constant 0 : index
    %c0_6 = arith.constant 0 : index
    %7 = vector.load %arg4[%c0_5, %c0_6] : memref<1x16xf32, #tpu.memory_space<vmem>>, vector<1x16xf32>
    %8 = vector.broadcast %7 : vector<1x16xf32> to vector<8x16xf32>
    %9 = arith.addf %6, %8 : vector<8x16xf32>
    %c0_7 = arith.constant 0 : index
    %c0_8 = arith.constant 0 : index
    %10 = vector.load %arg7[%c0_7, %c0_8] : memref<8x16xf32, #tpu.memory_space<vmem>>, vector<8x16xf32>
    %11 = arith.addf %10, %9 : vector<8x16xf32>
    %cst_9 = arith.constant 1.000000e+00 : f32
    %12 = vector.broadcast %cst_9 : f32 to vector<8x16xf32>
    %13 = arith.cmpf oge, %11, %12 : vector<8x16xf32>
    %14 = arith.extui %13 : vector<8x16xi1> to vector<8x16xi32>
    %15 = arith.sitofp %14 : vector<8x16xi32> to vector<8x16xf32>
    %16 = arith.subf %11, %15 : vector<8x16xf32>
    %c0_10 = arith.constant 0 : index
    %c0_11 = arith.constant 0 : index
    %17 = vector.load %arg7[%c0_10, %c0_11] : memref<8x16xf32, #tpu.memory_space<vmem>>, vector<8x16xf32>
    tpu.vector_store %arg7[%c0_10, %c0_11], %16 {strides = array<i32>} : memref<8x16xf32, #tpu.memory_space<vmem>>, vector<8x16xf32>,
    %18 = arith.truncf %15 : vector<8x16xf32> to vector<8x16xbf16>
    %c0_12 = arith.constant 0 : index
    %c0_13 = arith.constant 0 : index
    %c0_14 = arith.constant 0 : index
    %19 = vector.load %arg5[%c0_12, %c0_13, %c0_14] : memref<1x8x16xbf16, #tpu.memory_space<vmem>>, vector<1x8x16xbf16>
    %20 = vector.shape_cast %19 : vector<1x8x16xbf16> to vector<8x16xbf16>
    %21 = vector.shape_cast %18 : vector<8x16xbf16> to vector<1x8x16xbf16>
    tpu.vector_store %arg5[%c0_12, %c0_13, %c0_14], %21 {strides = array<i32>} : memref<1x8x16xbf16, #tpu.memory_space<vmem>>, vector<1x8x16xbf16>,
    %c0_15 = arith.constant 0 : index
    %c0_16 = arith.constant 0 : index
    %22 = vector.load %arg6[%c0_15, %c0_16] : memref<8x16xf32, #tpu.memory_space<vmem>>, vector<8x16xf32>
    %23 = arith.addf %22, %15 : vector<8x16xf32>
    %c3_i32 = arith.constant 3 : i32
    %24 = arith.cmpi eq, %arg1, %c3_i32 : i32
    %cst_17 = arith.constant 2.500000e-01 : f32
    %25 = vector.broadcast %cst_17 : f32 to vector<8x16xf32>
    %26 = arith.mulf %23, %25 : vector<8x16xf32>
    %27 = arith.select %24, %26, %23 : vector<8x16xf32>
    %c0_18 = arith.constant 0 : index
    %c0_19 = arith.constant 0 : index
    %28 = vector.load %arg6[%c0_18, %c0_19] : memref<8x16xf32, #tpu.memory_space<vmem>>, vector<8x16xf32>
    tpu.vector_store %arg6[%c0_18, %c0_19], %27 {strides = array<i32>} : memref<8x16xf32, #tpu.memory_space<vmem>>, vector<8x16xf32>,
    return
  }
  func.func @transform_0(%arg0: i32, %arg1: i32) -> (i32, i32, i32) {
    %c0_i32 = arith.constant 0 : i32
    %c0_i32_0 = arith.constant 0 : i32
    return %arg1, %arg0, %c0_i32 : i32, i32, i32
  }
  func.func @transform_1(%arg0: i32, %arg1: i32) -> (i32, i32) {
    %c0_i32 = arith.constant 0 : i32
    %c0_i32_0 = arith.constant 0 : i32
    %c0_i32_1 = arith.constant 0 : i32
    return %c0_i32, %c0_i32_0 : i32, i32
  }
  func.func @transform_2(%arg0: i32, %arg1: i32) -> (i32, i32) {
    %c0_i32 = arith.constant 0 : i32
    %c0_i32_0 = arith.constant 0 : i32
    %c0_i32_1 = arith.constant 0 : i32
    return %c0_i32, %c0_i32_0 : i32, i32
  }
  func.func @transform_3(%arg0: i32, %arg1: i32) -> (i32, i32, i32) {
    %c0_i32 = arith.constant 0 : i32
    %c0_i32_0 = arith.constant 0 : i32
    return %arg1, %arg0, %c0_i32 : i32, i32, i32
  }
  func.func @transform_4(%arg0: i32, %arg1: i32) -> (i32, i32) {
    %c0_i32 = arith.constant 0 : i32
    %c0_i32_0 = arith.constant 0 : i32
    return %arg0, %c0_i32 : i32, i32
  }
}

</mosaic_0001>

<bundles_post_ra>
// kernel: _lambda_.8
= control target key start
LH: loop header
LB: loop body
LE: loop exit
PB: predicated region body
PF: predicated region fallthrough
CT: control target
= control target key end

     0   :  { %s921_s15 = smov 0   ;;  %s923_s16 = smov 0   ;;  %s1358_s0 = inlined_call_operand.vmem [shape: f32[4,128,36], index: 0, kind: input, shape index: {}]   ;;  %s1359_s1 = inlined_call_operand.vmem [shape: f32[36,8], index: 1, kind: input, shape index: {}]   ;;  %s1360_s2 = inlined_call_operand.vmem [shape: f32[1,8], index: 2, kind: input, shape index: {}]   ;;  %s1361_s3 = inlined_call_operand.vmem [shape: bf16[4,128,8], index: 3, kind: output, shape index: {0}]   ;;  %s1362_s4 = inlined_call_operand.vmem [shape: f32[128,8], index: 4, kind: output, shape index: {1}]  }
   0x1   :  { %s925_s17 = smov 0  }
   0x2 LB: > { %s24_s18 = sadd.s32 1, %s888_s16  ;;  %p783_p0 = scmp.ge.s32.totalorder %s892_s17, 1  ;;  %s892_s17 = sphi %s925_s17, %s15_s17   ;;  %s888_s16 = sphi %s923_s16, %s1366_s16   ;;  %s884_s15 = sphi %s921_s15, %s1365_s15  }
   0x3   : > { %p25_p1 = scmp.ge.s32.totalorder %s24_s18, 4  ;;  %p186_p2 = scmp.lt.s32.totalorder %s892_s17, 5 }
   0x5   : > { %s1368_s18 = smov (%p25_p1, %s24_s18), 0  ;;  %p187_p3 = pnand %p783_p0, %p186_p2 }
   0x6   : > { %p226_p4 = scmp.lt.s32.totalorder (!%p187_p3), %s884_s15, 3  ;;  %p788_p5 = scmp.ne.s32.totalorder (!%p187_p3), %s884_s15, 0 }
   0x7   : > { %190 = sbr.rel (%p187_p3) target bundleno = 245 (0xf5), region = 32 }
   0xc   : > { %s227_s19 = scalar_select %p226_p4, %s884_s15, 3 }
   0xd   : > { %254 = sbr.rel (%p788_p5) target bundleno = 51 (0x33), region = 36 }
   0xe   : > { %s826_s20 = sshll.u32 %s227_s19, 7  ;;  %s827_s21 = sshll.u32 %s227_s19, 6 }
   0xf   : > { %s946_s24 = scalar_lea.vmem %s1358_s0, %s826_s20  ;;  %s951_s27 = scalar_lea.vmem %s1361_s3, %s827_s21 }
  0x12   : > { %vm255_vm0 = vcmask 64512   ;;  %v894_v0 = vmov 0.0  }
  0x13   : > { %256 = vst.msk [vmem:[#allocation2] sm:$0xff] %vm255_vm0, %v894_v0 }
  0x14   : > { %257 = vst.msk [vmem:[#allocation2 + $0x8] sm:$0xff] %vm255_vm0, %v894_v0 }
  0x15   : > { %258 = vst.msk [vmem:[#allocation2 + $0x10] sm:$0xff] %vm255_vm0, %v894_v0 }
  0x16   : > { %259 = vst.msk [vmem:[#allocation2 + $0x18] sm:$0xff] %vm255_vm0, %v894_v0 }
  0x17   : > { %260 = vst.msk [vmem:[#allocation2 + $0x20] sm:$0xff] %vm255_vm0, %v894_v0 }
  0x18   : > { %261 = vst.msk [vmem:[#allocation2 + $0x28] sm:$0xff] %vm255_vm0, %v894_v0 }
  0x19   : > { %262 = vst.msk [vmem:[#allocation2 + $0x30] sm:$0xff] %vm255_vm0, %v894_v0 }
  0x1a   : > { %263 = vst.msk [vmem:[#allocation2 + $0x38] sm:$0xff] %vm255_vm0, %v894_v0 }
  0x1b   : > { %264 = vst.msk [vmem:[#allocation2 + $0x40] sm:$0xff] %vm255_vm0, %v894_v0 }
  0x1c   : > { %265 = vst.msk [vmem:[#allocation2 + $0x48] sm:$0xff] %vm255_vm0, %v894_v0 }
  0x1d   : > { %266 = vst.msk [vmem:[#allocation2 + $0x50] sm:$0xff] %vm255_vm0, %v894_v0 }
  0x1e   : > { %267 = vst.msk [vmem:[#allocation2 + $0x58] sm:$0xff] %vm255_vm0, %v894_v0 }
  0x1f   : > { %268 = vst.msk [vmem:[#allocation2 + $0x60] sm:$0xff] %vm255_vm0, %v894_v0 }
  0x20   : > { %269 = vst.msk [vmem:[#allocation2 + $0x68] sm:$0xff] %vm255_vm0, %v894_v0 }
  0x21   : > { %270 = vst.msk [vmem:[#allocation2 + $0x70] sm:$0xff] %vm255_vm0, %v894_v0 }
  0x22   : > { %271 = vst.msk [vmem:[#allocation2 + $0x78] sm:$0xff] %vm255_vm0, %v894_v0 }
  0x23   : > { %272 = vst.msk [vmem:[%s1362_s4] sm:$0xff] %vm255_vm0, %v894_v0 }
  0x24   : > { %273 = vst.msk [vmem:[%s1362_s4 + $0x8] sm:$0xff] %vm255_vm0, %v894_v0 }
  0x25   : > { %274 = vst.msk [vmem:[%s1362_s4 + $0x10] sm:$0xff] %vm255_vm0, %v894_v0 }
  0x26   : > { %275 = vst.msk [vmem:[%s1362_s4 + $0x18] sm:$0xff] %vm255_vm0, %v894_v0 }
  0x27   : > { %276 = vst.msk [vmem:[%s1362_s4 + $0x20] sm:$0xff] %vm255_vm0, %v894_v0 }
  0x28   : > { %277 = vst.msk [vmem:[%s1362_s4 + $0x28] sm:$0xff] %vm255_vm0, %v894_v0 }
  0x29   : > { %278 = vst.msk [vmem:[%s1362_s4 + $0x30] sm:$0xff] %vm255_vm0, %v894_v0 }
  0x2a   : > { %279 = vst.msk [vmem:[%s1362_s4 + $0x38] sm:$0xff] %vm255_vm0, %v894_v0 }
  0x2b   : > { %280 = vst.msk [vmem:[%s1362_s4 + $0x40] sm:$0xff] %vm255_vm0, %v894_v0 }
  0x2c   : > { %281 = vst.msk [vmem:[%s1362_s4 + $0x48] sm:$0xff] %vm255_vm0, %v894_v0 }
  0x2d   : > { %282 = vst.msk [vmem:[%s1362_s4 + $0x50] sm:$0xff] %vm255_vm0, %v894_v0 }
  0x2e   : > { %283 = vst.msk [vmem:[%s1362_s4 + $0x58] sm:$0xff] %vm255_vm0, %v894_v0 }
  0x2f   : > { %284 = vst.msk [vmem:[%s1362_s4 + $0x60] sm:$0xff] %vm255_vm0, %v894_v0 }
  0x30   : > { %285 = vst.msk [vmem:[%s1362_s4 + $0x68] sm:$0xff] %vm255_vm0, %v894_v0 }
  0x31   : > { %286 = vst.msk [vmem:[%s1362_s4 + $0x70] sm:$0xff] %vm255_vm0, %v894_v0 }
  0x32   : > { %287 = vst.msk [vmem:[%s1362_s4 + $0x78] sm:$0xff] %vm255_vm0, %v894_v0 }
  0x33 PF: > { %v308_v1 = vld [vmem:[%s1359_s1 + $0x20] sm:$0xf]  ;;  %vm362_vm1 = vcmask 1043456   ;;  %v307_v2 = vld [vmem:[%s1359_s1 + $0x18] sm:$0xff]  ;;  %v306_v3 = vld [vmem:[%s1359_s1 + $0x10] sm:$0xff]  ;;  %vm313_vm2 = vcmask 293888  }
  0x34   : > { %829 = vmatpush.msk.msra.mxu2 %vm362_vm1, %v308_v1  ;;  %830 = vmatpush.msk.msra.mxu3 %vm362_vm1, %v308_v1  ;;  %v305_v4 = vld [vmem:[%s1359_s1 + $0x8] sm:$0xff]  ;;  %v304_v5 = vld [vmem:[%s1359_s1] sm:$0xff]  ;;  %v298_v14 = vld [vmem:[%s946_s24 + $0x50] sm:$0xff]  ;;  %p609_p6 = scmp.eq.s32.totalorder %s884_s15, 3  ;;  %v895_v40 = vmov 0.0   ;;  %vm527_vm5 = vcmask 64512  }
  0x35   : > { %789 = vmatpush.msk.msra.mxu0 %vm362_vm1, %v308_v1  ;;  %828 = vmatpush.msk.msra.mxu1 %vm362_vm1, %v308_v1  ;;  %v296_v6 = vld [vmem:[%s946_s24 + $0x40] sm:$0xff]  ;;  %v297_v10 = vld [vmem:[%s946_s24 + $0x48] sm:$0xff]  ;;  %v302_v15 = vld [vmem:[%s946_s24 + $0x70] sm:$0xff]  ;;  %vm560_vm6 = vcmask 60416  }
  0x36   : > { %832 = vmatpush.msra.mxu2 %v307_v2  ;;  %833 = vmatpush.msra.mxu3 %v307_v2  ;;  %v300_v7 = vld [vmem:[%s946_s24 + $0x60] sm:$0xff]  ;;  %v301_v11 = vld [vmem:[%s946_s24 + $0x68] sm:$0xff]  ;;  %v290_v16 = vld [vmem:[%s946_s24 + $0x10] sm:$0xff]  ;;  %s626_s6 = scalar_select %p609_p6, 1, 0 }
  0x37   : > { %378 = vmatpush.msra.mxu0 %v307_v2  ;;  %831 = vmatpush.msra.mxu1 %v307_v2  ;;  %v288_v8 = vld [vmem:[%s946_s24] sm:$0xff]  ;;  %v289_v12 = vld [vmem:[%s946_s24 + $0x8] sm:$0xff]  ;;  %v294_v17 = vld [vmem:[%s946_s24 + $0x30] sm:$0xff] }
  0x38   : > { %835 = vmatpush.msra.mxu2 %v306_v3  ;;  %836 = vmatpush.msra.mxu3 %v306_v3  ;;  %v292_v9 = vld [vmem:[%s946_s24 + $0x20] sm:$0xff]  ;;  %v293_v13 = vld [vmem:[%s946_s24 + $0x28] sm:$0xff]  ;;  %v299_v18 = vld [vmem:[%s946_s24 + $0x58] sm:$0xff]  ;;  %v627_v32 = vstv %s626_s6 }
  0x39   : > { %379 = vmatpush.msra.mxu0 %v306_v3  ;;  %834 = vmatpush.msra.mxu1 %v306_v3  ;;  %v303_v19 = vld [vmem:[%s946_s24 + $0x78] sm:$0xff]  ;;  %v1085_v22 = vld [vmem:[%s1360_s2] ss:$0 sm:$0xff]  ;;  %vm1099_vm7 = vcmp.eq.s32.totalorder %v627_v32, 1  ;;  %v432_v52 = vld [vmem:[#allocation2 + $0x8] sm:$0xff] }
  0x3a   : > { %838 = vmatpush.msra.mxu2 %v305_v4  ;;  %839 = vmatpush.msra.mxu3 %v305_v4  ;;  %v291_v20 = vld [vmem:[%s946_s24 + $0x18] sm:$0xff]  ;;  %v431_v24 = vld [vmem:[#allocation2] sm:$0xff]  ;;  %v436_v1 = vld [vmem:[#allocation2 + $0x28] sm:$0xff] }
  0x3b   : > { %380 = vmatpush.msra.mxu0 %v305_v4  ;;  %837 = vmatpush.msra.mxu1 %v305_v4  ;;  %v295_v21 = vld [vmem:[%s946_s24 + $0x38] sm:$0xff]  ;;  %v435_v26 = vld [vmem:[#allocation2 + $0x20] sm:$0xff]  ;;  %v586_v32 = vld [vmem:[%s1362_s4 + $0x48] sm:$0xff] }
  0x3c   : > { %841 = vmatpush.msra.mxu2 %v304_v5  ;;  %842 = vmatpush.msra.mxu3 %v304_v5  ;;  %v577_v31 = vld [vmem:[%s1362_s4] sm:$0xff] }
  0x3d   : > { %798 = vmatmul.msk.f32.vlgmr.msra.gmra.mxu2 %vm313_vm2, %v296_v6  ;;  %802 = vmatmul.msk.f32.vlgmr.msra.gmra.mxu3 %vm313_vm2, %v300_v7  ;;  %v581_v35 = vld [vmem:[%s1362_s4 + $0x20] sm:$0xff]  ;;  %v578_v6 = vld [vmem:[%s1362_s4 + $0x8] sm:$0xff] }
  0x3e   : > { %381 = vmatpush.msra.mxu0 %v304_v5  ;;  %840 = vmatpush.msra.mxu1 %v304_v5  ;;  %v439_v37 = vld [vmem:[#allocation2 + $0x40] sm:$0xff] }
  0x3f   : > { %790 = vmatmul.msk.f32.vlgmr.msra.gmra.mxu0 %vm313_vm2, %v288_v8  ;;  %794 = vmatmul.msk.f32.vlgmr.msra.gmra.mxu1 %vm313_vm2, %v292_v9  ;;  %v443_v39 = vld [vmem:[#allocation2 + $0x60] sm:$0xff] }
  0x40   : > { %v585_v56 = vld [vmem:[%s1362_s4 + $0x40] sm:$0xff] }
  0x41   : > { %v589_v59 = vld [vmem:[%s1362_s4 + $0x60] sm:$0xff] }
  0x45   : > { %799 = vmatmul.msk.f32.gmra.mxu2 %vm313_vm2, %v297_v10  ;;  %803 = vmatmul.msk.f32.gmra.mxu3 %vm313_vm2, %v301_v11  ;;  %v440_v11 = vld [vmem:[#allocation2 + $0x48] sm:$0xff] }
  0x47   : > { %791 = vmatmul.msk.f32.gmra.mxu0 %vm313_vm2, %v289_v12  ;;  %795 = vmatmul.msk.f32.gmra.mxu1 %vm313_vm2, %v293_v13 }
  0x4d   : > { %800 = vmatmul.msk.f32.gmra.mxu2 %vm313_vm2, %v298_v14  ;;  %804 = vmatmul.msk.f32.gmra.mxu3 %vm313_vm2, %v302_v15 }
  0x4f   : > { %792 = vmatmul.msk.f32.gmra.mxu0 %vm313_vm2, %v290_v16  ;;  %796 = vmatmul.msk.f32.gmra.mxu1 %vm313_vm2, %v294_v17 }
  0x55   : > { %801 = vmatmul.msk.f32.gmra.mxu2 %vm313_vm2, %v299_v18  ;;  %805 = vmatmul.msk.f32.gmra.mxu3 %vm313_vm2, %v303_v19 }
  0x57   : > { %793 = vmatmul.msk.f32.gmra.mxu0 %vm313_vm2, %v291_v20  ;;  %797 = vmatmul.msk.f32.gmra.mxu1 %vm313_vm2, %v295_v21  ;;  %v582_v20 = vld [vmem:[%s1362_s4 + $0x28] sm:$0xff] }
  0xbc   : > { %v383_v23 = vpop.f32.mrf.mxu0  ;;  %v395_v25 = vpop.f32.mrf.mxu1 }
  0xbd   : > { %v384_v27 = vadd.f32 %v1085_v22, %v383_v23  ;;  %v396_v28 = vadd.f32 %v1085_v22, %v395_v25  ;;  %v444_v25 = vld [vmem:[#allocation2 + $0x68] sm:$0xff] }
  0xbf   : > { %v447_v29 = vadd.f32 %v431_v24, %v384_v27  ;;  %v451_v30 = vadd.f32 %v435_v26, %v396_v28  ;;  %v433_v27 = vld [vmem:[#allocation2 + $0x10] sm:$0xff] }
  0xc0   : > { %v407_v33 = vpop.f32.mrf.mxu2  ;;  %v419_v34 = vpop.f32.mrf.mxu3 }
  0xc1   : > { %vm463_vm3 = vcmp.ge.f32.partialorder %v447_v29, 1.0  ;;  %vm467_vm4 = vcmp.ge.f32.partialorder %v451_v30, 1.0  ;;  %v408_v36 = vadd.f32 %v1085_v22, %v407_v33  ;;  %v420_v38 = vadd.f32 %v1085_v22, %v419_v34 }
  0xc2   : > { %v806_v41 = vsel %vm463_vm3, 1.0, %v895_v40  ;;  %v810_v42 = vsel %vm467_vm4, 1.0, %v895_v40 }
  0xc3   : > { %v511_v43 = vsub.f32 %v447_v29, %v806_v41  ;;  %v544_v44 = vpack.c.bf16 %v806_v41, %v806_v41  ;;  %v593_v45 = vadd.f32 %v806_v41, %v577_v31  ;;  %v515_v46 = vsub.f32 %v451_v30, %v810_v42 }
  0xc4   : > { %v597_v48 = vadd.f32 %v810_v42, %v581_v35  ;;  %v455_v49 = vadd.f32 %v439_v37, %v408_v36  ;;  %v459_v50 = vadd.f32 %v443_v39, %v420_v38  ;;  %v386_v51 = vpop.f32.mrf.mxu0  ;;  %v398_v53 = vpop.f32.mrf.mxu1  ;;  %v548_v55 = vpack.c.bf16 %v810_v42, %v810_v42 }
  0xc5   : > { %528 = vst.msk [vmem:[#allocation2] sm:$0xff] %vm527_vm5, %v511_v43  ;;  %v610_v54 = vmul.f32 0.25, %v593_v45  ;;  %v387_v57 = vadd.f32 %v1085_v22, %v386_v51  ;;  %v399_v60 = vadd.f32 %v1085_v22, %v398_v53 }
  0xc6   : > { %561 = vst.msk [vmem:[%s951_s27] sm:$0xf] %vm560_vm6, %v544_v44  ;;  %v614_v58 = vmul.f32 0.25, %v597_v48  ;;  %vm471_vm8 = vcmp.ge.f32.partialorder %v455_v49, 1.0  ;;  %vm475_vm9 = vcmp.ge.f32.partialorder %v459_v50, 1.0 }
  0xc7   : > { %v629_v61 = vsel %vm1099_vm7, %v610_v54, %v593_v45  ;;  %532 = vst.msk [vmem:[#allocation2 + $0x20] sm:$0xff] %vm527_vm5, %v515_v46  ;;  %v814_v62 = vsel %vm471_vm8, 1.0, %v895_v40  ;;  %v818_v63 = vsel %vm475_vm9, 1.0, %v895_v40  ;;  %v448_v0 = vadd.f32 %v432_v52, %v387_v57  ;;  %v590_v45 = vld [vmem:[%s1362_s4 + $0x68] sm:$0xff] }
  0xc8   : > { %645 = vst.msk [vmem:[%s1362_s4] sm:$0xff] %vm527_vm5, %v629_v61  ;;  %v633_v2 = vsel %vm1099_vm7, %v614_v58, %v597_v48  ;;  %v519_v3 = vsub.f32 %v455_v49, %v814_v62  ;;  %v552_v4 = vpack.c.bf16 %v814_v62, %v814_v62  ;;  %v601_v5 = vadd.f32 %v814_v62, %v585_v56  ;;  %v410_v7 = vpop.f32.mrf.mxu2  ;;  %v422_v8 = vpop.f32.mrf.mxu3  ;;  %v579_v48 = vld [vmem:[%s1362_s4 + $0x10] sm:$0xff] }
  0xc9   : > { %565 = vst.msk [vmem:[%s951_s27 + $0x10] sm:$0xf] %vm560_vm6, %v548_v55  ;;  %v523_v9 = vsub.f32 %v459_v50, %v818_v63  ;;  %v605_v10 = vadd.f32 %v818_v63, %v589_v59  ;;  %vm464_vm10 = vcmp.ge.f32.partialorder %v448_v0, 1.0  ;;  %v452_v14 = vadd.f32 %v436_v1, %v399_v60  ;;  %v437_v50 = vld [vmem:[#allocation2 + $0x30] sm:$0xff] }
  0xca   : > { %649 = vst.msk [vmem:[%s1362_s4 + $0x20] sm:$0xff] %vm527_vm5, %v633_v2  ;;  %v618_v12 = vmul.f32 0.25, %v601_v5  ;;  %v807_v13 = vsel %vm464_vm10, 1.0, %v895_v40  ;;  %v411_v15 = vadd.f32 %v1085_v22, %v410_v7  ;;  %v556_v16 = vpack.c.bf16 %v818_v63, %v818_v63  ;;  %v441_v55 = vld [vmem:[#allocation2 + $0x50] sm:$0xff] }
  0xcb   : > { %536 = vst.msk [vmem:[#allocation2 + $0x40] sm:$0xff] %vm527_vm5, %v519_v3  ;;  %v622_v17 = vmul.f32 0.25, %v605_v10  ;;  %v512_v18 = vsub.f32 %v448_v0, %v807_v13  ;;  %v594_v19 = vadd.f32 %v807_v13, %v578_v6  ;;  %vm468_vm11 = vcmp.ge.f32.partialorder %v452_v14, 1.0  ;;  %v445_v63 = vld [vmem:[#allocation2 + $0x70] sm:$0xff] }
  0xcc   : > { %569 = vst.msk [vmem:[%s951_s27 + $0x20] sm:$0xf] %vm560_vm6, %v552_v4  ;;  %v637_v21 = vsel %vm1099_vm7, %v618_v12, %v601_v5  ;;  %v1144_v23 = vadd.f32 %v440_v11, %v411_v15  ;;  %v423_v24 = vadd.f32 %v1085_v22, %v422_v8  ;;  %v389_v26 = vpop.f32.mrf.mxu0  ;;  %v401_v28 = vpop.f32.mrf.mxu1  ;;  %v811_v31 = vsel %vm468_vm11, 1.0, %v895_v40  ;;  %v583_v3 = vld [vmem:[%s1362_s4 + $0x30] sm:$0xff]  ;;  %v438_v11 = vld [vmem:[#allocation2 + $0x38] sm:$0xff] }
  0xcd   : > { %653 = vst.msk [vmem:[%s1362_s4 + $0x40] sm:$0xff] %vm527_vm5, %v637_v21  ;;  %v641_v29 = vsel %vm1099_vm7, %v622_v17, %v605_v10  ;;  %v611_v30 = vmul.f32 0.25, %v594_v19  ;;  %v390_v33 = vadd.f32 %v1085_v22, %v389_v26  ;;  %v545_v34 = vpack.c.bf16 %v807_v13, %v807_v13 }
  0xce   : > { %540 = vst.msk [vmem:[#allocation2 + $0x60] sm:$0xff] %vm527_vm5, %v523_v9  ;;  %v598_v35 = vadd.f32 %v811_v31, %v582_v20  ;;  %vm472_vm12 = vcmp.ge.f32.partialorder %v1144_v23, 1.0  ;;  %v516_v36 = vsub.f32 %v452_v14, %v811_v31  ;;  %v1163_v38 = vadd.f32 %v444_v25, %v423_v24  ;;  %v434_v9 = vld [vmem:[#allocation2 + $0x18] sm:$0xff]  ;;  %v587_v14 = vld [vmem:[%s1362_s4 + $0x50] sm:$0xff] }
  0xcf   : > { %573 = vst.msk [vmem:[%s951_s27 + $0x30] sm:$0xf] %vm560_vm6, %v556_v16  ;;  %v815_v37 = vsel %vm472_vm12, 1.0, %v895_v40  ;;  %v1165_v39 = vadd.f32 %v433_v27, %v390_v33  ;;  %v630_v41 = vsel %vm1099_vm7, %v611_v30, %v594_v19  ;;  %v549_v42 = vpack.c.bf16 %v811_v31, %v811_v31  ;;  %v591_v27 = vld [vmem:[%s1362_s4 + $0x70] sm:$0xff] }
  0xd0   : > { %657 = vst.msk [vmem:[%s1362_s4 + $0x60] sm:$0xff] %vm527_vm5, %v641_v29  ;;  %v615_v43 = vmul.f32 0.25, %v598_v35  ;;  %v602_v44 = vadd.f32 %v815_v37, %v586_v32  ;;  %v413_v46 = vpop.f32.mrf.mxu2  ;;  %vm476_vm13 = vcmp.ge.f32.partialorder %v1163_v38, 1.0  ;;  %v402_v49 = vadd.f32 %v1085_v22, %v401_v28  ;;  %v425_v56 = vpop.f32.mrf.mxu3  ;;  %v442_v28 = vld [vmem:[#allocation2 + $0x58] sm:$0xff] }
  0xd1   : > { %529 = vst.msk [vmem:[#allocation2 + $0x8] sm:$0xff] %vm527_vm5, %v512_v18  ;;  %vm465_vm14 = vcmp.ge.f32.partialorder %v1165_v39, 1.0  ;;  %v414_v51 = vadd.f32 %v1085_v22, %v413_v46  ;;  %v819_v53 = vsel %vm476_vm13, 1.0, %v895_v40  ;;  %v520_v58 = vsub.f32 %v1144_v23, %v815_v37 }
  0xd2   : > { %562 = vst.msk [vmem:[%s951_s27 + $0x4] sm:$0xf] %vm560_vm6, %v545_v34  ;;  %v619_v52 = vmul.f32 0.25, %v602_v44  ;;  %v1188_v54 = vsel %vm465_vm14, 1.0, %v895_v40  ;;  %v634_v57 = vsel %vm1099_vm7, %v615_v43, %v598_v35  ;;  %v606_v59 = vadd.f32 %v819_v53, %v590_v45 }
  0xd3   : > { %646 = vst.msk [vmem:[%s1362_s4 + $0x8] sm:$0xff] %vm527_vm5, %v630_v41  ;;  %v553_v60 = vpack.c.bf16 %v815_v37, %v815_v37  ;;  %v595_v61 = vadd.f32 %v1188_v54, %v579_v48  ;;  %v453_v62 = vadd.f32 %v437_v50, %v402_v49  ;;  %v1204_v4 = vadd.f32 %v441_v55, %v414_v51  ;;  %v580_v37 = vld [vmem:[%s1362_s4 + $0x18] sm:$0xff] }
  0xd4   : > { %533 = vst.msk [vmem:[#allocation2 + $0x28] sm:$0xff] %vm527_vm5, %v516_v36  ;;  %v392_v0 = vpop.f32.mrf.mxu0  ;;  %v404_v1 = vpop.f32.mrf.mxu1  ;;  %v623_v2 = vmul.f32 0.25, %v606_v59  ;;  %v426_v5 = vadd.f32 %v1085_v22, %v425_v56  ;;  %v638_v7 = vsel %vm1099_vm7, %v619_v52, %v602_v44  ;;  %v524_v8 = vsub.f32 %v1163_v38, %v819_v53  ;;  %v584_v48 = vld [vmem:[%s1362_s4 + $0x38] sm:$0xff] }
  0xd5   : > { %566 = vst.msk [vmem:[%s951_s27 + $0x14] sm:$0xf] %vm560_vm6, %v549_v42  ;;  %v393_v6 = vadd.f32 %v1085_v22, %v392_v0  ;;  %vm469_vm15 = vcmp.ge.f32.partialorder %v453_v62, 1.0  ;;  %v405_v10 = vadd.f32 %v1085_v22, %v404_v1  ;;  %v557_v12 = vpack.c.bf16 %v819_v53, %v819_v53  ;;  %v446_v50 = vld [vmem:[#allocation2 + $0x78] sm:$0xff] }
  0xd6   : > { %650 = vst.msk [vmem:[%s1362_s4 + $0x28] sm:$0xff] %vm527_vm5, %v634_v57  ;;  %v812_v13 = vsel %vm469_vm15, 1.0, %v895_v40  ;;  %vm473_vm0 = vcmp.ge.f32.partialorder %v1204_v4, 1.0  ;;  %v1222_v15 = vadd.f32 %v445_v63, %v426_v5  ;;  %v642_v16 = vsel %vm1099_vm7, %v623_v2, %v606_v59  ;;  %v588_v56 = vld [vmem:[%s1362_s4 + $0x58] sm:$0xff] }
  0xd7   : > { %537 = vst.msk [vmem:[#allocation2 + $0x48] sm:$0xff] %vm527_vm5, %v520_v58  ;;  %v513_v17 = vsub.f32 %v1165_v39, %v1188_v54  ;;  %v612_v18 = vmul.f32 0.25, %v595_v61  ;;  %v599_v19 = vadd.f32 %v812_v13, %v583_v3  ;;  %v816_v21 = vsel %vm473_vm0, 1.0, %v895_v40  ;;  %v592_v0 = vld [vmem:[%s1362_s4 + $0x78] sm:$0xff] }
  0xd8   : > { %570 = vst.msk [vmem:[%s951_s27 + $0x24] sm:$0xf] %vm560_vm6, %v553_v60  ;;  %v416_v20 = vpop.f32.mrf.mxu2  ;;  %vm477_vm1 = vcmp.ge.f32.partialorder %v1222_v15, 1.0  ;;  %v1236_v23 = vadd.f32 %v434_v9, %v393_v6  ;;  %v1238_v24 = vadd.f32 %v438_v11, %v405_v10  ;;  %v546_v25 = vpack.c.bf16 %v1188_v54, %v1188_v54  ;;  %v428_v39 = vpop.f32.mrf.mxu3 }
  0xd9   : > { %654 = vst.msk [vmem:[%s1362_s4 + $0x48] sm:$0xff] %vm527_vm5, %v638_v7  ;;  %v603_v26 = vadd.f32 %v816_v21, %v587_v14  ;;  %v616_v29 = vmul.f32 0.25, %v599_v19  ;;  %v820_v30 = vsel %vm477_vm1, 1.0, %v895_v40  ;;  %v417_v31 = vadd.f32 %v1085_v22, %v416_v20 }
  0xda   : > { %541 = vst.msk [vmem:[#allocation2 + $0x68] sm:$0xff] %vm527_vm5, %v524_v8  ;;  %vm466_vm2 = vcmp.ge.f32.partialorder %v1236_v23, 1.0  ;;  %v631_v32 = vsel %vm1099_vm7, %v612_v18, %v595_v61  ;;  %v517_v33 = vsub.f32 %v453_v62, %v812_v13  ;;  %v550_v34 = vpack.c.bf16 %v812_v13, %v812_v13 }
  0xdb   : > { %574 = vst.msk [vmem:[%s951_s27 + $0x34] sm:$0xf] %vm560_vm6, %v557_v12  ;;  %v607_v35 = vadd.f32 %v820_v30, %v591_v27  ;;  %v809_v36 = vsel %vm466_vm2, 1.0, %v895_v40  ;;  %vm470_vm3 = vcmp.ge.f32.partialorder %v1238_v24, 1.0  ;;  %v458_v38 = vadd.f32 %v442_v28, %v417_v31 }
  0xdc   : > { %658 = vst.msk [vmem:[%s1362_s4 + $0x68] sm:$0xff] %vm527_vm5, %v642_v16  ;;  %v620_v41 = vmul.f32 0.25, %v603_v26  ;;  %v635_v42 = vsel %vm1099_vm7, %v616_v29, %v599_v19  ;;  %v521_v43 = vsub.f32 %v1204_v4, %v816_v21  ;;  %v554_v44 = vpack.c.bf16 %v816_v21, %v816_v21 }
  0xdd   : > { %530 = vst.msk [vmem:[#allocation2 + $0x10] sm:$0xff] %vm527_vm5, %v513_v17  ;;  %v596_v45 = vadd.f32 %v809_v36, %v580_v37  ;;  %v813_v46 = vsel %vm470_vm3, 1.0, %v895_v40  ;;  %vm474_vm4 = vcmp.ge.f32.partialorder %v458_v38, 1.0  ;;  %v429_v49 = vadd.f32 %v1085_v22, %v428_v39 }
  0xde   : > { %563 = vst.msk [vmem:[%s951_s27 + $0x8] sm:$0xf] %vm560_vm6, %v546_v25  ;;  %v624_v51 = vmul.f32 0.25, %v607_v35  ;;  %v639_v52 = vsel %vm1099_vm7, %v620_v41, %v603_v26  ;;  %v525_v53 = vsub.f32 %v1222_v15, %v820_v30  ;;  %v558_v54 = vpack.c.bf16 %v820_v30, %v820_v30 }
  0xdf   : > { %647 = vst.msk [vmem:[%s1362_s4 + $0x10] sm:$0xff] %vm527_vm5, %v631_v32  ;;  %v600_v55 = vadd.f32 %v813_v46, %v584_v48  ;;  %v817_v22 = vsel %vm474_vm4, 1.0, %v895_v40  ;;  %v462_v57 = vadd.f32 %v446_v50, %v429_v49  ;;  %v613_v58 = vmul.f32 0.25, %v596_v45 }
  0xe0   : > { %534 = vst.msk [vmem:[#allocation2 + $0x30] sm:$0xff] %vm527_vm5, %v517_v33  ;;  %v643_v59 = vsel %vm1099_vm7, %v624_v51, %v607_v35  ;;  %v514_v60 = vsub.f32 %v1236_v23, %v809_v36  ;;  %v547_v61 = vpack.c.bf16 %v809_v36, %v809_v36  ;;  %v604_v62 = vadd.f32 %v817_v22, %v588_v56 }
  0xe1   : > { %567 = vst.msk [vmem:[%s951_s27 + $0x18] sm:$0xf] %vm560_vm6, %v550_v34  ;;  %vm478_vm8 = vcmp.ge.f32.partialorder %v462_v57, 1.0  ;;  %v617_v1 = vmul.f32 0.25, %v600_v55  ;;  %v632_v2 = vsel %vm1099_vm7, %v613_v58, %v596_v45  ;;  %v518_v3 = vsub.f32 %v1238_v24, %v813_v46 }
  0xe2   : > { %651 = vst.msk [vmem:[%s1362_s4 + $0x30] sm:$0xff] %vm527_vm5, %v635_v42  ;;  %v821_v63 = vsel %vm478_vm8, 1.0, %v895_v40  ;;  %v551_v40 = vpack.c.bf16 %v813_v46, %v813_v46  ;;  %v621_v5 = vmul.f32 0.25, %v604_v62  ;;  %v522_v7 = vsub.f32 %v458_v38, %v817_v22 }
  0xe3   : > { %538 = vst.msk [vmem:[#allocation2 + $0x50] sm:$0xff] %vm527_vm5, %v521_v43  ;;  %v608_v4 = vadd.f32 %v821_v63, %v592_v0  ;;  %v636_v6 = vsel %vm1099_vm7, %v617_v1, %v600_v55  ;;  %v555_v8 = vpack.c.bf16 %v817_v22, %v817_v22  ;;  %v526_v11 = vsub.f32 %v462_v57, %v821_v63 }
  0xe4   : > { %571 = vst.msk [vmem:[%s951_s27 + $0x28] sm:$0xf] %vm560_vm6, %v554_v44  ;;  %v640_v10 = vsel %vm1099_vm7, %v621_v5, %v604_v62  ;;  %v559_v12 = vpack.c.bf16 %v821_v63, %v821_v63 }
  0xe5   : > { %655 = vst.msk [vmem:[%s1362_s4 + $0x50] sm:$0xff] %vm527_vm5, %v639_v52  ;;  %v625_v9 = vmul.f32 0.25, %v608_v4 }
  0xe6   : > { %542 = vst.msk [vmem:[#allocation2 + $0x70] sm:$0xff] %vm527_vm5, %v525_v53 }
  0xe7   : > { %575 = vst.msk [vmem:[%s951_s27 + $0x38] sm:$0xf] %vm560_vm6, %v558_v54  ;;  %v644_v13 = vsel %vm1099_vm7, %v625_v9, %v608_v4 }
  0xe8   : > { %659 = vst.msk [vmem:[%s1362_s4 + $0x70] sm:$0xff] %vm527_vm5, %v643_v59 }
  0xe9   : > { %531 = vst.msk [vmem:[#allocation2 + $0x18] sm:$0xff] %vm527_vm5, %v514_v60 }
  0xea   : > { %564 = vst.msk [vmem:[%s951_s27 + $0xc] sm:$0xf] %vm560_vm6, %v547_v61 }
  0xeb   : > { %648 = vst.msk [vmem:[%s1362_s4 + $0x18] sm:$0xff] %vm527_vm5, %v632_v2 }
  0xec   : > { %535 = vst.msk [vmem:[#allocation2 + $0x38] sm:$0xff] %vm527_vm5, %v518_v3 }
  0xed   : > { %568 = vst.msk [vmem:[%s951_s27 + $0x1c] sm:$0xf] %vm560_vm6, %v551_v40 }
  0xee   : > { %652 = vst.msk [vmem:[%s1362_s4 + $0x38] sm:$0xff] %vm527_vm5, %v636_v6 }
  0xef   : > { %539 = vst.msk [vmem:[#allocation2 + $0x58] sm:$0xff] %vm527_vm5, %v522_v7 }
  0xf0   : > { %572 = vst.msk [vmem:[%s951_s27 + $0x2c] sm:$0xf] %vm560_vm6, %v555_v8 }
  0xf1   : > { %656 = vst.msk [vmem:[%s1362_s4 + $0x58] sm:$0xff] %vm527_vm5, %v640_v10 }
  0xf2   : > { %543 = vst.msk [vmem:[#allocation2 + $0x78] sm:$0xff] %vm527_vm5, %v526_v11 }
  0xf3   : > { %576 = vst.msk [vmem:[%s951_s27 + $0x3c] sm:$0xf] %vm560_vm6, %v559_v12 }
  0xf4   : > { %660 = vst.msk [vmem:[%s1362_s4 + $0x78] sm:$0xff] %vm527_vm5, %v644_v13 }
  0xf5 PF: > { %s15_s17 = sadd.s32 1, %s892_s17   ;;  %s1365_s15 = smov %s888_s16 }
  0xf6   : > { %p12_p7 = scmp.ge.s32.totalorder %s15_s17, 6   ;;  %s1366_s16 = smov %s1368_s18 }
  0xf8   :  { %14 = sbr.rel (!%p12_p7) target bundleno = 2 (0x2), region = 78 }

// kernel: _lambda_.9
= control target key start
LH: loop header
LB: loop body
LE: loop exit
PB: predicated region body
PF: predicated region fallthrough
CT: control target
= control target key end

     0   :  { %10 = vsyncpa [#allocation4], 0  ;;  %s701_s15 = smov 0   ;;  %s703_s16 = smov 0   ;;  %s798_s0 = inlined_call_operand.vmem [shape: bf16[4,32,72], index: 0, kind: input, shape index: {}]   ;;  %s799_s1 = inlined_call_operand.vmem [shape: bf16[72,16], index: 1, kind: input, shape index: {}]   ;;  %s800_s2 = inlined_call_operand.vmem [shape: f32[1,16], index: 2, kind: input, shape index: {}]   ;;  %s801_s3 = inlined_call_operand.vmem [shape: bf16[4,32,16], index: 3, kind: output, shape index: {0}]   ;;  %s802_s4 = inlined_call_operand.hbm [shape: f32[32,16], index: 4, kind: output, shape index: {1}]  }
   0x1   :  { %s705_s17 = smov 0  }
   0x2 LB: > { %s522_s18 = sadd.s32 4294967295, %s669_s17   ;;  %s25_s19 = sadd.s32 1, %s665_s16  ;;  %s669_s17 = sphi %s705_s17, %s16_s17   ;;  %s665_s16 = sphi %s703_s16, %s806_s16   ;;  %s661_s15 = sphi %s701_s15, %s805_s15  }
   0x3   : > { %p26_p0 = scmp.ge.s32.totalorder %s25_s19, 4  ;;  %p526_p1 = scmp.ge.s32.totalorder %s669_s17, 1 }
   0x4   : > { %p187_p2 = scmp.lt.s32.totalorder %s669_s17, 5 }
   0x5   : > { %s808_s19 = smov (%p26_p0, %s25_s19), 0 }
   0x6   : > { %p188_p3 = pnand %p526_p1, %p187_p2 }
   0x7   : > { %p222_p4 = scmp.lt.s32.totalorder (!%p188_p3), %s661_s15, 3  ;;  %p531_p5 = scmp.ne.s32.totalorder (!%p188_p3), %s661_s15, 0 }
   0x8   : > { %191 = sbr.rel (%p188_p3) target bundleno = 204 (0xcc), region = 32 }
   0xd   : > { %s223_s20 = scalar_select %p222_p4, %s661_s15, 3 }
   0xe   : > { %246 = sbr.rel (%p531_p5) target bundleno = 28 (0x1c), region = 36 }
   0xf   : > { %s566_s21 = sshll.u32 %s223_s20, 4 }
  0x10   : > { %s727_s24 = scalar_lea.vmem %s798_s0, %s566_s21  ;;  %s732_s27 = scalar_lea.vmem %s801_s3, %s566_s21 }
  0x13   : > { %vm247_vm0 = vcmask 130048   ;;  %v671_v0 = vmov 0.0  }
  0x14   : > { %248 = vst.msk [vmem:[#allocation2] sm:$0xff] %vm247_vm0, %v671_v0 }
  0x15   : > { %249 = vst.msk [vmem:[#allocation2 + $0x8] sm:$0xff] %vm247_vm0, %v671_v0 }
  0x16   : > { %250 = vst.msk [vmem:[#allocation2 + $0x10] sm:$0xff] %vm247_vm0, %v671_v0 }
  0x17   : > { %251 = vst.msk [vmem:[#allocation2 + $0x18] sm:$0xff] %vm247_vm0, %v671_v0 }
  0x18   : > { %252 = vst.msk [vmem:[#allocation3] sm:$0xff] %vm247_vm0, %v671_v0 }
  0x19   : > { %253 = vst.msk [vmem:[#allocation3 + $0x8] sm:$0xff] %vm247_vm0, %v671_v0 }
  0x1a   : > { %254 = vst.msk [vmem:[#allocation3 + $0x10] sm:$0xff] %vm247_vm0, %v671_v0 }
  0x1b   : > { %255 = vst.msk [vmem:[#allocation3 + $0x18] sm:$0xff] %vm247_vm0, %v671_v0 }
  0x1c PF: > { %v268_v1 = vld [vmem:[%s799_s1 + $0x20] sm:$0xf]  ;;  %vm317_vm1 = vcmask 1043456   ;;  %v573_v5 = vld [vmem:[%s799_s1 + $0x18] sm:$0xff]  ;;  %v572_v6 = vld [vmem:[%s799_s1 + $0x10] sm:$0xff]  ;;  %vm310_vm2 = vcmask 588800  }
  0x1d   : > { %v300_v2 = vunpack.c.l.b16 %v268_v1  ;;  %v571_v7 = vld [vmem:[%s799_s1 + $0x8] sm:$0xff]  ;;  %v570_v8 = vld [vmem:[%s799_s1] sm:$0xff]  ;;  %p386_p6 = scmp.eq.s32.totalorder %s661_s15, 3  ;;  %v342_v15 = vld [vmem:[#allocation2 + $0x10] sm:$0xff]  ;;  %v672_v23 = vmov 0.0   ;;  %vm364_vm5 = vcmask 130048  }
  0x1e   : > { %v568_v9 = vld [vmem:[%s727_s24] sm:$0xff]  ;;  %v569_v10 = vld [vmem:[%s727_s24 + $0x8] sm:$0xff]  ;;  %vm373_vm6 = vcmask 125952   ;;  %v343_v35 = vld [vmem:[#allocation2 + $0x18] sm:$0xff]  ;;  %s673_s15 = smov [#allocation3]   ;;  %s425_s23 = sshll.u32 %s802_s4, 4  ;;  %s426_s23 = int_to_ptr.hbm [resolvable:$true] %s425_s23 }
  0x1f   : > { %v305_v3 = vpack.c.b16 %v300_v2, %v300_v2  ;;  %v614_v11 = vld [vmem:[%s800_s2] ss:$0 sm:$0xff]  ;;  %s391_s14 = scalar_select %p386_p6, 1, 0  ;;  %v341_v33 = vld [vmem:[#allocation2 + $0x8] sm:$0xff] }
  0x20   : > { %v340_v13 = vld [vmem:[#allocation2] sm:$0xff]  ;;  %v379_v45 = vld [vmem:[#allocation3 + $0x8] sm:$0xff]  ;;  %s423_s20 = sshll.u32 %s673_s15, 4  ;;  %p583_p7 = scmp.eq.s32.totalorder %s522_s18, 3  ;;  %s424_s20 = int_to_ptr.vmem [resolvable:$true] %s423_s20 }
  0x21   : > { %v319_v4 = vsel %vm317_vm1, %v305_v3, 0  ;;  %v378_v20 = vld [vmem:[#allocation3] sm:$0xff]  ;;  %v392_v21 = vstv %s391_s14  ;;  %v380_v22 = vld [vmem:[#allocation3 + $0x10] sm:$0xff]  ;;  %s674_s24 = smov 128   ;;  %s675_s25 = smov 8  }
  0x22   : > { %324 = vmatpush.bf16.msra.mxu0 %v319_v4  ;;  %574 = vmatpush.bf16.msra.mxu1 %v319_v4  ;;  %vm756_vm7 = vcmp.eq.s32.totalorder %v392_v21, 1  ;;  %v381_v46 = vld [vmem:[#allocation3 + $0x18] sm:$0xff] }
  0x26   : > { %325 = vmatpush.bf16.msra.mxu0 %v573_v5  ;;  %575 = vmatpush.bf16.msra.mxu1 %v573_v5 }
  0x2a   : > { %326 = vmatpush.bf16.msra.mxu0 %v572_v6  ;;  %576 = vmatpush.bf16.msra.mxu1 %v572_v6 }
  0x2e   : > { %327 = vmatpush.bf16.msra.mxu0 %v571_v7  ;;  %577 = vmatpush.bf16.msra.mxu1 %v571_v7 }
  0x32   : > { %328 = vmatpush.bf16.msra.mxu0 %v570_v8  ;;  %578 = vmatpush.bf16.msra.mxu1 %v570_v8 }
  0x35   : > { %556 = vmatmul.msk.bf16.vlgmr.msra.gmra.mxu0 %vm310_vm2, %v568_v9  ;;  %557 = vmatmul.msk.bf16.vlgmr.msra.gmra.mxu1 %vm310_vm2, %v569_v10 }
  0xb2   : > { %v330_v12 = vpop.f32.mrf.mxu0  ;;  %v335_v14 = vpop.f32.mrf.mxu1 }
  0xb3   : > { %v331_v16 = vadd.f32 %v614_v11, %v330_v12  ;;  %v336_v17 = vadd.f32 %v614_v11, %v335_v14 }
  0xb5   : > { %v344_v18 = vadd.f32 %v340_v13, %v331_v16  ;;  %v346_v19 = vadd.f32 %v342_v15, %v336_v17 }
  0xb7   : > { %vm348_vm3 = vcmp.ge.f32.partialorder %v344_v18, 1.0  ;;  %vm350_vm4 = vcmp.ge.f32.partialorder %v346_v19, 1.0 }
  0xb8   : > { %v558_v24 = vsel %vm348_vm3, 1.0, %v672_v23  ;;  %v560_v25 = vsel %vm350_vm4, 1.0, %v672_v23 }
  0xb9   : > { %v360_v26 = vsub.f32 %v344_v18, %v558_v24  ;;  %v369_v27 = vpack.c.bf16 %v558_v24, %v558_v24  ;;  %v382_v28 = vadd.f32 %v558_v24, %v378_v20  ;;  %v362_v29 = vsub.f32 %v346_v19, %v560_v25 }
  0xba   : > { %v384_v31 = vadd.f32 %v560_v25, %v380_v22  ;;  %v332_v32 = vpop.f32.mrf.mxu0  ;;  %v337_v34 = vpop.f32.mrf.mxu1  ;;  %v371_v37 = vpack.c.bf16 %v560_v25, %v560_v25 }
  0xbb   : > { %365 = vst.msk [vmem:[#allocation2] sm:$0xff] %vm364_vm5, %v360_v26  ;;  %v387_v36 = vmul.f32 0.25, %v382_v28  ;;  %v333_v38 = vadd.f32 %v614_v11, %v332_v32  ;;  %v338_v39 = vadd.f32 %v614_v11, %v337_v34 }
  0xbc   : > { %374 = vst.msk [vmem:[%s732_s27] sm:$0xf] %vm373_vm6, %v369_v27  ;;  %v389_v40 = vmul.f32 0.25, %v384_v31 }
  0xbd   : > { %v394_v41 = vsel %vm756_vm7, %v387_v36, %v382_v28  ;;  %367 = vst.msk [vmem:[#allocation2 + $0x10] sm:$0xff] %vm364_vm5, %v362_v29  ;;  %v345_v42 = vadd.f32 %v341_v33, %v333_v38  ;;  %v347_v43 = vadd.f32 %v343_v35, %v338_v39 }
  0xbe   : > { %398 = vst.msk [vmem:[#allocation3] sm:$0xff] %vm364_vm5, %v394_v41  ;;  %v396_v44 = vsel %vm756_vm7, %v389_v40, %v384_v31 }
  0xbf   : > { %376 = vst.msk [vmem:[%s732_s27 + $0x8] sm:$0xf] %vm373_vm6, %v371_v37  ;;  %vm349_vm8 = vcmp.ge.f32.partialorder %v345_v42, 1.0  ;;  %vm351_vm9 = vcmp.ge.f32.partialorder %v347_v43, 1.0 }
  0xc0   : > { %400 = vst.msk [vmem:[#allocation3 + $0x10] sm:$0xff] %vm364_vm5, %v396_v44  ;;  %v559_v47 = vsel %vm349_vm8, 1.0, %v672_v23  ;;  %v561_v48 = vsel %vm351_vm9, 1.0, %v672_v23 }
  0xc1   : > { %v361_v49 = vsub.f32 %v345_v42, %v559_v47  ;;  %v370_v50 = vpack.c.bf16 %v559_v47, %v559_v47  ;;  %v383_v51 = vadd.f32 %v559_v47, %v379_v45  ;;  %v363_v52 = vsub.f32 %v347_v43, %v561_v48 }
  0xc2   : > { %v385_v53 = vadd.f32 %v561_v48, %v381_v46  ;;  %v372_v55 = vpack.c.bf16 %v561_v48, %v561_v48 }
  0xc3   : > { %366 = vst.msk [vmem:[#allocation2 + $0x8] sm:$0xff] %vm364_vm5, %v361_v49  ;;  %v388_v54 = vmul.f32 0.25, %v383_v51 }
  0xc4   : > { %375 = vst.msk [vmem:[%s732_s27 + $0x4] sm:$0xf] %vm373_vm6, %v370_v50  ;;  %v390_v56 = vmul.f32 0.25, %v385_v53 }
  0xc5   : > { %v395_v57 = vsel %vm756_vm7, %v388_v54, %v383_v51  ;;  %368 = vst.msk [vmem:[#allocation2 + $0x18] sm:$0xff] %vm364_vm5, %v363_v52 }
  0xc6   : > { %399 = vst.msk [vmem:[#allocation3 + $0x8] sm:$0xff] %vm364_vm5, %v395_v57  ;;  %v397_v58 = vsel %vm756_vm7, %v390_v56, %v385_v53 }
  0xc7   : > { %377 = vst.msk [vmem:[%s732_s27 + $0xc] sm:$0xf] %vm373_vm6, %v372_v55 }
  0xc8   : > { %401 = vst.msk [vmem:[#allocation3 + $0x18] sm:$0xff] %vm364_vm5, %v397_v58 }
  0xc9   : > { %580 = dma.vmem_to_hbm [thread:$0]  (%p583_p7), %s424_s20, 512, %s426_s23, [#allocation4], %s674_s24, %s674_s24, %s675_s25  }
  0xca   : > { %656 = dma.done.wait (%p583_p7), [#allocation4], 512  }
  0xcb   : > { %658 = vsyncadd (%p583_p7), [#allocation4], 4294966784 }
  0xcc PF: > { %s16_s17 = sadd.s32 1, %s669_s17   ;;  %s805_s15 = smov %s665_s16 }
  0xcd   : > { %p13_p8 = scmp.ge.s32.totalorder %s16_s17, 6   ;;  %s806_s16 = smov %s808_s19 }
  0xcf   :  { %15 = sbr.rel (!%p13_p8) target bundleno = 2 (0x2), region = 76 }
  0xd4   :  { %454 = vsyncpa [#allocation4], 1 }
  0xd5   :  { %456 = vsyncpa [#allocation4 + $0x1], 1 }

// kernel: _lambda_.10
= control target key start
LH: loop header
LB: loop body
LE: loop exit
PB: predicated region body
PF: predicated region fallthrough
CT: control target
= control target key end

     0   :  { %10 = vsyncpa [#allocation4], 0  ;;  %s650_s15 = smov 0   ;;  %s652_s16 = smov 0   ;;  %s731_s0 = inlined_call_operand.vmem [shape: bf16[4,32,16], index: 0, kind: input, shape index: {}]   ;;  %s732_s1 = inlined_call_operand.vmem [shape: bf16[16,8], index: 1, kind: input, shape index: {}]   ;;  %s733_s2 = inlined_call_operand.vmem [shape: f32[1,8], index: 2, kind: input, shape index: {}]   ;;  %s734_s3 = inlined_call_operand.vmem [shape: bf16[4,32,8], index: 3, kind: output, shape index: {0}]   ;;  %s735_s4 = inlined_call_operand.hbm [shape: f32[32,8], index: 4, kind: output, shape index: {1}]  }
   0x1   :  { %s654_s17 = smov 0  }
   0x2 LB: > { %s490_s18 = sadd.s32 4294967295, %s618_s17   ;;  %s25_s19 = sadd.s32 1, %s614_s16  ;;  %s618_s17 = sphi %s654_s17, %s16_s17   ;;  %s614_s16 = sphi %s652_s16, %s739_s16   ;;  %s610_s15 = sphi %s650_s15, %s738_s15  }
   0x3   : > { %p26_p0 = scmp.ge.s32.totalorder %s25_s19, 4  ;;  %p494_p1 = scmp.ge.s32.totalorder %s618_s17, 1 }
   0x4   : > { %p187_p2 = scmp.lt.s32.totalorder %s618_s17, 5 }
   0x5   : > { %s741_s19 = smov (%p26_p0, %s25_s19), 0 }
   0x6   : > { %p188_p3 = pnand %p494_p1, %p187_p2 }
   0x7   : > { %p222_p4 = scmp.lt.s32.totalorder (!%p188_p3), %s610_s15, 3  ;;  %p499_p5 = scmp.ne.s32.totalorder (!%p188_p3), %s610_s15, 0 }
   0x8   : > { %191 = sbr.rel (%p188_p3) target bundleno = 183 (0xb7), region = 32 }
   0xd   : > { %s223_s20 = scalar_select %p222_p4, %s610_s15, 3 }
   0xe   : > { %246 = sbr.rel (%p499_p5) target bundleno = 28 (0x1c), region = 36 }
   0xf   : > { %s522_s21 = sshll.u32 %s223_s20, 4 }
  0x10   : > { %s229_s24 = scalar_lea.vmem %s731_s0, %s522_s21  ;;  %s679_s27 = scalar_lea.vmem %s734_s3, %s522_s21 }
  0x13   : > { %vm247_vm0 = vcmask 64512   ;;  %v620_v0 = vmov 0.0  }
  0x14   : > { %248 = vst.msk [vmem:[#allocation2] sm:$0xff] %vm247_vm0, %v620_v0 }
  0x15   : > { %249 = vst.msk [vmem:[#allocation2 + $0x8] sm:$0xff] %vm247_vm0, %v620_v0 }
  0x16   : > { %250 = vst.msk [vmem:[#allocation2 + $0x10] sm:$0xff] %vm247_vm0, %v620_v0 }
  0x17   : > { %251 = vst.msk [vmem:[#allocation2 + $0x18] sm:$0xff] %vm247_vm0, %v620_v0 }
  0x18   : > { %252 = vst.msk [vmem:[#allocation3] sm:$0xff] %vm247_vm0, %v620_v0 }
  0x19   : > { %253 = vst.msk [vmem:[#allocation3 + $0x8] sm:$0xff] %vm247_vm0, %v620_v0 }
  0x1a   : > { %254 = vst.msk [vmem:[#allocation3 + $0x10] sm:$0xff] %vm247_vm0, %v620_v0 }
  0x1b   : > { %255 = vst.msk [vmem:[#allocation3 + $0x18] sm:$0xff] %vm247_vm0, %v620_v0 }
  0x1c PF: > { %v526_v1 = vld [vmem:[%s732_s1] sm:$0xff]  ;;  %v525_v3 = vld [vmem:[%s229_s24 + $0x8] sm:$0xff]  ;;  %vm282_vm1 = vcmask 130048   ;;  %p354_p6 = scmp.eq.s32.totalorder %s610_s15, 3  ;;  %v621_v16 = vmov 0.0   ;;  %vm332_vm4 = vcmask 64512  }
  0x1d   : > { %v524_v2 = vld [vmem:[%s229_s24] sm:$0xff]  ;;  %296 = vmatpush.bf16.msra.mxu0 %v526_v1  ;;  %527 = vmatpush.bf16.msra.mxu1 %v526_v1  ;;  %v310_v8 = vld [vmem:[#allocation2 + $0x10] sm:$0xff]  ;;  %vm341_vm5 = vcmask 60416   ;;  %v309_v26 = vld [vmem:[#allocation2 + $0x8] sm:$0xff]  ;;  %s622_s7 = smov [#allocation3]   ;;  %s393_s11 = sshll.u32 %s735_s4, 4  ;;  %s394_s11 = int_to_ptr.hbm [resolvable:$true] %s393_s11 }
  0x1e   : > { %v563_v4 = vld [vmem:[%s733_s2] ss:$0 sm:$0xff]  ;;  %s359_s6 = scalar_select %p354_p6, 1, 0  ;;  %v311_v28 = vld [vmem:[#allocation2 + $0x18] sm:$0xff] }
  0x1f   : > { %v308_v6 = vld [vmem:[#allocation2] sm:$0xff]  ;;  %s391_s8 = sshll.u32 %s622_s7, 4  ;;  %p532_p7 = scmp.eq.s32.totalorder %s490_s18, 3  ;;  %s392_s8 = int_to_ptr.vmem [resolvable:$true] %s391_s8 }
  0x20   : > { %512 = vmatmul.msk.bf16.vlgmr.msra.gmra.mxu0 %vm282_vm1, %v524_v2  ;;  %513 = vmatmul.msk.bf16.vlgmr.msra.gmra.mxu1 %vm282_vm1, %v525_v3  ;;  %v346_v13 = vld [vmem:[#allocation3] sm:$0xff]  ;;  %v360_v14 = vstv %s359_s6  ;;  %v347_v38 = vld [vmem:[#allocation3 + $0x8] sm:$0xff]  ;;  %s623_s12 = smov 128   ;;  %s624_s13 = smov 8  }
  0x21   : > { %v348_v15 = vld [vmem:[#allocation3 + $0x10] sm:$0xff]  ;;  %vm689_vm6 = vcmp.eq.s32.totalorder %v360_v14, 1 }
  0x22   : > { %v349_v39 = vld [vmem:[#allocation3 + $0x18] sm:$0xff] }
  0x9d   : > { %v298_v5 = vpop.f32.mrf.mxu0  ;;  %v303_v7 = vpop.f32.mrf.mxu1 }
  0x9e   : > { %v299_v9 = vadd.f32 %v563_v4, %v298_v5  ;;  %v304_v10 = vadd.f32 %v563_v4, %v303_v7 }
  0xa0   : > { %v312_v11 = vadd.f32 %v308_v6, %v299_v9  ;;  %v314_v12 = vadd.f32 %v310_v8, %v304_v10 }
  0xa2   : > { %vm316_vm2 = vcmp.ge.f32.partialorder %v312_v11, 1.0  ;;  %vm318_vm3 = vcmp.ge.f32.partialorder %v314_v12, 1.0 }
  0xa3   : > { %v514_v17 = vsel %vm316_vm2, 1.0, %v621_v16  ;;  %v516_v18 = vsel %vm318_vm3, 1.0, %v621_v16 }
  0xa4   : > { %v328_v19 = vsub.f32 %v312_v11, %v514_v17  ;;  %v337_v20 = vpack.c.bf16 %v514_v17, %v514_v17  ;;  %v350_v21 = vadd.f32 %v514_v17, %v346_v13  ;;  %v330_v22 = vsub.f32 %v314_v12, %v516_v18 }
  0xa5   : > { %v352_v24 = vadd.f32 %v516_v18, %v348_v15  ;;  %v300_v25 = vpop.f32.mrf.mxu0  ;;  %v305_v27 = vpop.f32.mrf.mxu1  ;;  %v339_v30 = vpack.c.bf16 %v516_v18, %v516_v18 }
  0xa6   : > { %333 = vst.msk [vmem:[#allocation2] sm:$0xff] %vm332_vm4, %v328_v19  ;;  %v355_v29 = vmul.f32 0.25, %v350_v21  ;;  %v301_v31 = vadd.f32 %v563_v4, %v300_v25  ;;  %v306_v32 = vadd.f32 %v563_v4, %v305_v27 }
  0xa7   : > { %342 = vst.msk [vmem:[%s679_s27] sm:$0xf] %vm341_vm5, %v337_v20  ;;  %v357_v33 = vmul.f32 0.25, %v352_v24 }
  0xa8   : > { %v362_v34 = vsel %vm689_vm6, %v355_v29, %v350_v21  ;;  %335 = vst.msk [vmem:[#allocation2 + $0x10] sm:$0xff] %vm332_vm4, %v330_v22  ;;  %v313_v35 = vadd.f32 %v309_v26, %v301_v31  ;;  %v315_v36 = vadd.f32 %v311_v28, %v306_v32 }
  0xa9   : > { %366 = vst.msk [vmem:[#allocation3] sm:$0xff] %vm332_vm4, %v362_v34  ;;  %v364_v37 = vsel %vm689_vm6, %v357_v33, %v352_v24 }
  0xaa   : > { %344 = vst.msk [vmem:[%s679_s27 + $0x8] sm:$0xf] %vm341_vm5, %v339_v30  ;;  %vm317_vm7 = vcmp.ge.f32.partialorder %v313_v35, 1.0  ;;  %vm319_vm8 = vcmp.ge.f32.partialorder %v315_v36, 1.0 }
  0xab   : > { %368 = vst.msk [vmem:[#allocation3 + $0x10] sm:$0xff] %vm332_vm4, %v364_v37  ;;  %v515_v40 = vsel %vm317_vm7, 1.0, %v621_v16  ;;  %v517_v41 = vsel %vm319_vm8, 1.0, %v621_v16 }
  0xac   : > { %v329_v42 = vsub.f32 %v313_v35, %v515_v40  ;;  %v338_v43 = vpack.c.bf16 %v515_v40, %v515_v40  ;;  %v351_v44 = vadd.f32 %v515_v40, %v347_v38  ;;  %v331_v45 = vsub.f32 %v315_v36, %v517_v41 }
  0xad   : > { %v353_v46 = vadd.f32 %v517_v41, %v349_v39  ;;  %v340_v48 = vpack.c.bf16 %v517_v41, %v517_v41 }
  0xae   : > { %334 = vst.msk [vmem:[#allocation2 + $0x8] sm:$0xff] %vm332_vm4, %v329_v42  ;;  %v356_v47 = vmul.f32 0.25, %v351_v44 }
  0xaf   : > { %343 = vst.msk [vmem:[%s679_s27 + $0x4] sm:$0xf] %vm341_vm5, %v338_v43  ;;  %v358_v49 = vmul.f32 0.25, %v353_v46 }
  0xb0   : > { %v363_v50 = vsel %vm689_vm6, %v356_v47, %v351_v44  ;;  %336 = vst.msk [vmem:[#allocation2 + $0x18] sm:$0xff] %vm332_vm4, %v331_v45 }
  0xb1   : > { %367 = vst.msk [vmem:[#allocation3 + $0x8] sm:$0xff] %vm332_vm4, %v363_v50  ;;  %v365_v51 = vsel %vm689_vm6, %v358_v49, %v353_v46 }
  0xb2   : > { %345 = vst.msk [vmem:[%s679_s27 + $0xc] sm:$0xf] %vm341_vm5, %v340_v48 }
  0xb3   : > { %369 = vst.msk [vmem:[#allocation3 + $0x18] sm:$0xff] %vm332_vm4, %v365_v51 }
  0xb4   : > { %529 = dma.vmem_to_hbm [thread:$0]  (%p532_p7), %s392_s8, 512, %s394_s11, [#allocation4], %s623_s12, %s623_s12, %s624_s13  }
  0xb5   : > { %605 = dma.done.wait (%p532_p7), [#allocation4], 512  }
  0xb6   : > { %607 = vsyncadd (%p532_p7), [#allocation4], 4294966784 }
  0xb7 PF: > { %s16_s17 = sadd.s32 1, %s618_s17   ;;  %s738_s15 = smov %s614_s16 }
  0xb8   : > { %p13_p8 = scmp.ge.s32.totalorder %s16_s17, 6   ;;  %s739_s16 = smov %s741_s19 }
  0xba   :  { %15 = sbr.rel (!%p13_p8) target bundleno = 2 (0x2), region = 76 }
  0xbf   :  { %422 = vsyncpa [#allocation4], 1 }
  0xc0   :  { %424 = vsyncpa [#allocation4 + $0x1], 1 }

// kernel: _lambda_.12
= control target key start
LH: loop header
LB: loop body
LE: loop exit
PB: predicated region body
PF: predicated region fallthrough
CT: control target
= control target key end

     0   :  { %10 = vsyncpa [#allocation4], 0  ;;  %s528_s15 = smov 0   ;;  %s530_s16 = smov 0   ;;  %s584_s0 = inlined_call_operand.vmem [shape: bf16[4,8,16], index: 0, kind: input, shape index: {}]   ;;  %s585_s1 = inlined_call_operand.vmem [shape: bf16[16,4], index: 1, kind: input, shape index: {}]   ;;  %s586_s2 = inlined_call_operand.vmem [shape: f32[1,4], index: 2, kind: input, shape index: {}]   ;;  %s587_s3 = inlined_call_operand.vmem [shape: bf16[4,8,4], index: 3, kind: output, shape index: {0}]   ;;  %s588_s4 = inlined_call_operand.hbm [shape: f32[8,4], index: 4, kind: output, shape index: {1}]  }
   0x1   :  { %s532_s17 = smov 0  }
   0x2 LB: > { %s391_s18 = sadd.s32 4294967295, %s498_s17   ;;  %s25_s19 = sadd.s32 1, %s494_s16  ;;  %s498_s17 = sphi %s532_s17, %s16_s17   ;;  %s494_s16 = sphi %s530_s16, %s590_s16   ;;  %s490_s15 = sphi %s528_s15, %s589_s15  }
   0x3   : > { %p26_p0 = scmp.ge.s32.totalorder %s25_s19, 4  ;;  %p395_p1 = scmp.ge.s32.totalorder %s498_s17, 1 }
   0x4   : > { %p184_p2 = scmp.lt.s32.totalorder %s498_s17, 5 }
   0x5   : > { %s592_s19 = smov (%p26_p0, %s25_s19), 0 }
   0x6   : > { %p185_p3 = pnand %p395_p1, %p184_p2 }
   0x7   : > { %p214_p4 = scmp.lt.s32.totalorder (!%p185_p3), %s490_s15, 3  ;;  %p398_p5 = scmp.ne.s32.totalorder (!%p185_p3), %s490_s15, 0 }
   0x8   : > { %188 = sbr.rel (%p185_p3) target bundleno = 167 (0xa7), region = 32 }
   0xd   : > { %s215_s20 = scalar_select %p214_p4, %s490_s15, 3 }
   0xe   : > { %232 = sbr.rel (%p398_p5) target bundleno = 22 (0x16), region = 36 }
   0xf   : > { %s396_s21 = sshll.u32 %s215_s20, 2 }
  0x10   : > { %s220_s24 = scalar_lea.vmem %s584_s0, %s396_s21  ;;  %s557_s27 = scalar_lea.vmem %s587_s3, %s396_s21 }
  0x13   : > { %vm233_vm0 = vcmask 31744   ;;  %v500_v0 = vmov 0.0  }
  0x14   : > { %234 = vst.msk [vmem:[#allocation2] sm:$0xff] %vm233_vm0, %v500_v0 }
  0x15   : > { %235 = vst.msk [vmem:[#allocation3] sm:$0xff] %vm233_vm0, %v500_v0 }
  0x16 PF: > { %v409_v1 = vld [vmem:[%s585_s1] sm:$0xff]  ;;  %vm249_vm1 = vcmask 130048   ;;  %p279_p6 = scmp.eq.s32.totalorder %s490_s15, 3  ;;  %v501_v10 = vmov 0.0   ;;  %vm272_vm3 = vcmask 31744   ;;  %vm275_vm4 = vcmask 27648  }
  0x17   : > { %260 = vmatpush.bf16.msra.mxu0 %v409_v1  ;;  %v236_v2 = vld [vmem:[%s220_s24] sm:$0xf]  ;;  %s502_s7 = smov [#allocation3]   ;;  %s306_s11 = sshll.u32 %s588_s4, 4  ;;  %s307_s11 = int_to_ptr.hbm [resolvable:$true] %s306_s11 }
  0x18   : > { %v443_v3 = vld [vmem:[%s586_s2] ss:$0 sm:$0xff]  ;;  %s281_s6 = scalar_select %p279_p6, 1, 0 }
  0x19   : > { %s304_s8 = sshll.u32 %s502_s7, 4  ;;  %p414_p7 = scmp.eq.s32.totalorder %s391_s18, 3  ;;  %s305_s8 = int_to_ptr.vmem [resolvable:$true] %s304_s8 }
  0x1a   : > { %403 = vmatmul.msk.bf16.vlgmr.msra.gmra.mxu0 %vm249_vm1, %v236_v2  ;;  %v282_v9 = vstv %s281_s6 }
  0x1b   : > { %v266_v5 = vld [vmem:[#allocation2] sm:$0xff]  ;;  %vm283_vm5 = vcmp.eq.s32.totalorder %v282_v9, 1 }
  0x1c   : > { %v277_v8 = vld [vmem:[#allocation3] sm:$0xff] }
  0x97   : > { %v262_v4 = vpop.f32.mrf.mxu0 }
  0x98   : > { %v263_v6 = vadd.f32 %v443_v3, %v262_v4 }
  0x9a   : > { %v267_v7 = vadd.f32 %v266_v5, %v263_v6 }
  0x9c   : > { %vm268_vm2 = vcmp.ge.f32.partialorder %v267_v7, 1.0 }
  0x9d   : > { %v404_v11 = vsel %vm268_vm2, 1.0, %v501_v10 }
  0x9e   : > { %v271_v12 = vsub.f32 %v267_v7, %v404_v11  ;;  %v274_v13 = vpack.c.bf16 %v404_v11, %v404_v11  ;;  %v278_v14 = vadd.f32 %v404_v11, %v277_v8 }
  0x9f   : > { %v264_v15 = vpop.f32.mrf.mxu0 }
  0xa0   : > { %273 = vst.msk [vmem:[#allocation2] sm:$0xff] %vm272_vm3, %v271_v12  ;;  %v280_v16 = vmul.f32 0.25, %v278_v14 }
  0xa1   : > { %276 = vst.msk [vmem:[%s557_s27] sm:$0xf] %vm275_vm4, %v274_v13 }
  0xa2   : > { %v284_v17 = vsel %vm283_vm5, %v280_v16, %v278_v14 }
  0xa3   : > { %285 = vst.msk [vmem:[#allocation3] sm:$0xff] %vm272_vm3, %v284_v17 }
  0xa4   : > { %411 = dma.vmem_to_hbm [thread:$0]  (%p414_p7), %s305_s8, 128, %s307_s11, [#allocation4]  }
  0xa5   : > { %485 = dma.done.wait (%p414_p7), [#allocation4], 128  }
  0xa6   : > { %487 = vsyncadd (%p414_p7), [#allocation4], 4294967168 }
  0xa7 PF: > { %s16_s17 = sadd.s32 1, %s498_s17   ;;  %s589_s15 = smov %s494_s16 }
  0xa8   : > { %p13_p8 = scmp.ge.s32.totalorder %s16_s17, 6   ;;  %s590_s16 = smov %s592_s19 }
  0xaa   :  { %15 = sbr.rel (!%p13_p8) target bundleno = 2 (0x2), region = 76 }
  0xaf   :  { %330 = vsyncpa [#allocation4], 1 }
  0xb0   :  { %332 = vsyncpa [#allocation4 + $0x1], 1 }

// kernel: _lambda_.11
= control target key start
LH: loop header
LB: loop body
LE: loop exit
PB: predicated region body
PF: predicated region fallthrough
CT: control target
= control target key end

     0   :  { %10 = vsyncpa [#allocation4], 0  ;;  %s575_s15 = smov 0   ;;  %s577_s16 = smov 0   ;;  %s643_s0 = inlined_call_operand.vmem [shape: bf16[4,8,72], index: 0, kind: input, shape index: {}]   ;;  %s644_s1 = inlined_call_operand.vmem [shape: bf16[72,16], index: 1, kind: input, shape index: {}]   ;;  %s645_s2 = inlined_call_operand.vmem [shape: f32[1,16], index: 2, kind: input, shape index: {}]   ;;  %s646_s3 = inlined_call_operand.vmem [shape: bf16[4,8,16], index: 3, kind: output, shape index: {0}]   ;;  %s647_s4 = inlined_call_operand.hbm [shape: f32[8,16], index: 4, kind: output, shape index: {1}]  }
   0x1   :  { %s579_s17 = smov 0  }
   0x2 LB: > { %s423_s18 = sadd.s32 4294967295, %s545_s17   ;;  %s25_s19 = sadd.s32 1, %s541_s16  ;;  %s545_s17 = sphi %s579_s17, %s16_s17   ;;  %s541_s16 = sphi %s577_s16, %s649_s16   ;;  %s537_s15 = sphi %s575_s15, %s648_s15  }
   0x3   : > { %p26_p0 = scmp.ge.s32.totalorder %s25_s19, 4  ;;  %p427_p1 = scmp.ge.s32.totalorder %s545_s17, 1 }
   0x4   : > { %p184_p2 = scmp.lt.s32.totalorder %s545_s17, 5 }
   0x5   : > { %s651_s19 = smov (%p26_p0, %s25_s19), 0 }
   0x6   : > { %p185_p3 = pnand %p427_p1, %p184_p2 }
   0x7   : > { %p214_p4 = scmp.lt.s32.totalorder (!%p185_p3), %s537_s15, 3  ;;  %p430_p5 = scmp.ne.s32.totalorder (!%p185_p3), %s537_s15, 0 }
   0x8   : > { %188 = sbr.rel (%p185_p3) target bundleno = 188 (0xbc), region = 32 }
   0xd   : > { %s215_s20 = scalar_select %p214_p4, %s537_s15, 3 }
   0xe   : > { %232 = sbr.rel (%p430_p5) target bundleno = 22 (0x16), region = 36 }
   0xf   : > { %s428_s21 = sshll.u32 %s215_s20, 2 }
  0x10   : > { %s220_s24 = scalar_lea.vmem %s643_s0, %s428_s21  ;;  %s604_s27 = scalar_lea.vmem %s646_s3, %s428_s21 }
  0x13   : > { %vm233_vm0 = vcmask 130048   ;;  %v547_v0 = vmov 0.0  }
  0x14   : > { %234 = vst.msk [vmem:[#allocation2] sm:$0xff] %vm233_vm0, %v547_v0 }
  0x15   : > { %235 = vst.msk [vmem:[#allocation3] sm:$0xff] %vm233_vm0, %v547_v0 }
  0x16 PF: > { %v245_v1 = vld [vmem:[%s644_s1 + $0x20] sm:$0xf]  ;;  %vm281_vm1 = vcmask 1043456   ;;  %v456_v5 = vld [vmem:[%s644_s1 + $0x18] sm:$0xff]  ;;  %v455_v6 = vld [vmem:[%s644_s1 + $0x10] sm:$0xff]  ;;  %vm277_vm2 = vcmask 588800  }
  0x17   : > { %v267_v2 = vunpack.c.l.b16 %v245_v1  ;;  %v454_v7 = vld [vmem:[%s644_s1 + $0x8] sm:$0xff]  ;;  %v453_v8 = vld [vmem:[%s644_s1] sm:$0xff]  ;;  %p311_p6 = scmp.eq.s32.totalorder %s537_s15, 3  ;;  %v548_v17 = vmov 0.0   ;;  %vm304_vm4 = vcmask 130048   ;;  %vm307_vm5 = vcmask 125952  }
  0x18   : > { %v236_v9 = vld [vmem:[%s220_s24] sm:$0xf]  ;;  %s549_s20 = smov [#allocation3]   ;;  %s338_s23 = sshll.u32 %s647_s4, 4  ;;  %s339_s23 = int_to_ptr.hbm [resolvable:$true] %s338_s23 }
  0x19   : > { %v272_v3 = vpack.c.b16 %v267_v2, %v267_v2  ;;  %v490_v10 = vld [vmem:[%s645_s2] ss:$0 sm:$0xff]  ;;  %s313_s14 = scalar_select %p311_p6, 1, 0 }
  0x1a   : > { %s336_s21 = sshll.u32 %s549_s20, 4  ;;  %p461_p7 = scmp.eq.s32.totalorder %s423_s18, 3  ;;  %s337_s21 = int_to_ptr.vmem [resolvable:$true] %s336_s21 }
  0x1b   : > { %v283_v4 = vsel %vm281_vm1, %v272_v3, 0  ;;  %v298_v12 = vld [vmem:[#allocation2] sm:$0xff]  ;;  %v314_v16 = vstv %s313_s14 }
  0x1c   : > { %288 = vmatpush.bf16.msra.mxu0 %v283_v4  ;;  %v309_v15 = vld [vmem:[#allocation3] sm:$0xff]  ;;  %vm315_vm6 = vcmp.eq.s32.totalorder %v314_v16, 1 }
  0x20   : > { %289 = vmatpush.bf16.msra.mxu0 %v456_v5 }
  0x24   : > { %290 = vmatpush.bf16.msra.mxu0 %v455_v6 }
  0x28   : > { %291 = vmatpush.bf16.msra.mxu0 %v454_v7 }
  0x2c   : > { %292 = vmatpush.bf16.msra.mxu0 %v453_v8 }
  0x2f   : > { %447 = vmatmul.msk.bf16.vlgmr.msra.gmra.mxu0 %vm277_vm2, %v236_v9 }
  0xac   : > { %v294_v11 = vpop.f32.mrf.mxu0 }
  0xad   : > { %v295_v13 = vadd.f32 %v490_v10, %v294_v11 }
  0xaf   : > { %v299_v14 = vadd.f32 %v298_v12, %v295_v13 }
  0xb1   : > { %vm300_vm3 = vcmp.ge.f32.partialorder %v299_v14, 1.0 }
  0xb2   : > { %v448_v18 = vsel %vm300_vm3, 1.0, %v548_v17 }
  0xb3   : > { %v303_v19 = vsub.f32 %v299_v14, %v448_v18  ;;  %v306_v20 = vpack.c.bf16 %v448_v18, %v448_v18  ;;  %v310_v21 = vadd.f32 %v448_v18, %v309_v15 }
  0xb4   : > { %v296_v22 = vpop.f32.mrf.mxu0 }
  0xb5   : > { %305 = vst.msk [vmem:[#allocation2] sm:$0xff] %vm304_vm4, %v303_v19  ;;  %v312_v23 = vmul.f32 0.25, %v310_v21 }
  0xb6   : > { %308 = vst.msk [vmem:[%s604_s27] sm:$0xf] %vm307_vm5, %v306_v20 }
  0xb7   : > { %v316_v24 = vsel %vm315_vm6, %v312_v23, %v310_v21 }
  0xb8   : > { %317 = vst.msk [vmem:[#allocation3] sm:$0xff] %vm304_vm4, %v316_v24 }
  0xb9   : > { %458 = dma.vmem_to_hbm [thread:$0]  (%p461_p7), %s337_s21, 128, %s339_s23, [#allocation4]  }
  0xba   : > { %532 = dma.done.wait (%p461_p7), [#allocation4], 128  }
  0xbb   : > { %534 = vsyncadd (%p461_p7), [#allocation4], 4294967168 }
  0xbc PF: > { %s16_s17 = sadd.s32 1, %s545_s17   ;;  %s648_s15 = smov %s541_s16 }
  0xbd   : > { %p13_p8 = scmp.ge.s32.totalorder %s16_s17, 6   ;;  %s649_s16 = smov %s651_s19 }
  0xbf   :  { %15 = sbr.rel (!%p13_p8) target bundleno = 2 (0x2), region = 76 }
  0xc4   :  { %362 = vsyncpa [#allocation4], 1 }
  0xc5   :  { %364 = vsyncpa [#allocation4 + $0x1], 1 }

// kernel: _lambda_.14
= control target key start
LH: loop header
LB: loop body
LE: loop exit
PB: predicated region body
PF: predicated region fallthrough
CT: control target
= control target key end

     0   :  { %10 = vsyncpa [#allocation4], 0  ;;  %s528_s15 = smov 0   ;;  %s530_s16 = smov 0   ;;  %s584_s0 = inlined_call_operand.vmem [shape: bf16[4,8,16], index: 0, kind: input, shape index: {}]   ;;  %s585_s1 = inlined_call_operand.vmem [shape: bf16[16,8], index: 1, kind: input, shape index: {}]   ;;  %s586_s2 = inlined_call_operand.vmem [shape: f32[1,8], index: 2, kind: input, shape index: {}]   ;;  %s587_s3 = inlined_call_operand.vmem [shape: bf16[4,8,8], index: 3, kind: output, shape index: {0}]   ;;  %s588_s4 = inlined_call_operand.hbm [shape: f32[8,8], index: 4, kind: output, shape index: {1}]  }
   0x1   :  { %s532_s17 = smov 0  }
   0x2 LB: > { %s391_s18 = sadd.s32 4294967295, %s498_s17   ;;  %s25_s19 = sadd.s32 1, %s494_s16  ;;  %s498_s17 = sphi %s532_s17, %s16_s17   ;;  %s494_s16 = sphi %s530_s16, %s590_s16   ;;  %s490_s15 = sphi %s528_s15, %s589_s15  }
   0x3   : > { %p26_p0 = scmp.ge.s32.totalorder %s25_s19, 4  ;;  %p395_p1 = scmp.ge.s32.totalorder %s498_s17, 1 }
   0x4   : > { %p184_p2 = scmp.lt.s32.totalorder %s498_s17, 5 }
   0x5   : > { %s592_s19 = smov (%p26_p0, %s25_s19), 0 }
   0x6   : > { %p185_p3 = pnand %p395_p1, %p184_p2 }
   0x7   : > { %p214_p4 = scmp.lt.s32.totalorder (!%p185_p3), %s490_s15, 3  ;;  %p398_p5 = scmp.ne.s32.totalorder (!%p185_p3), %s490_s15, 0 }
   0x8   : > { %188 = sbr.rel (%p185_p3) target bundleno = 167 (0xa7), region = 32 }
   0xd   : > { %s215_s20 = scalar_select %p214_p4, %s490_s15, 3 }
   0xe   : > { %232 = sbr.rel (%p398_p5) target bundleno = 22 (0x16), region = 36 }
   0xf   : > { %s396_s21 = sshll.u32 %s215_s20, 2 }
  0x10   : > { %s220_s24 = scalar_lea.vmem %s584_s0, %s396_s21  ;;  %s557_s27 = scalar_lea.vmem %s587_s3, %s396_s21 }
  0x13   : > { %vm233_vm0 = vcmask 64512   ;;  %v500_v0 = vmov 0.0  }
  0x14   : > { %234 = vst.msk [vmem:[#allocation2] sm:$0xff] %vm233_vm0, %v500_v0 }
  0x15   : > { %235 = vst.msk [vmem:[#allocation3] sm:$0xff] %vm233_vm0, %v500_v0 }
  0x16 PF: > { %v409_v1 = vld [vmem:[%s585_s1] sm:$0xff]  ;;  %vm249_vm1 = vcmask 130048   ;;  %p279_p6 = scmp.eq.s32.totalorder %s490_s15, 3  ;;  %v501_v10 = vmov 0.0   ;;  %vm272_vm3 = vcmask 64512   ;;  %vm275_vm4 = vcmask 60416  }
  0x17   : > { %260 = vmatpush.bf16.msra.mxu0 %v409_v1  ;;  %v236_v2 = vld [vmem:[%s220_s24] sm:$0xf]  ;;  %s502_s7 = smov [#allocation3]   ;;  %s306_s11 = sshll.u32 %s588_s4, 4  ;;  %s307_s11 = int_to_ptr.hbm [resolvable:$true] %s306_s11 }
  0x18   : > { %v443_v3 = vld [vmem:[%s586_s2] ss:$0 sm:$0xff]  ;;  %s281_s6 = scalar_select %p279_p6, 1, 0 }
  0x19   : > { %s304_s8 = sshll.u32 %s502_s7, 4  ;;  %p414_p7 = scmp.eq.s32.totalorder %s391_s18, 3  ;;  %s305_s8 = int_to_ptr.vmem [resolvable:$true] %s304_s8 }
  0x1a   : > { %403 = vmatmul.msk.bf16.vlgmr.msra.gmra.mxu0 %vm249_vm1, %v236_v2  ;;  %v282_v9 = vstv %s281_s6 }
  0x1b   : > { %v266_v5 = vld [vmem:[#allocation2] sm:$0xff]  ;;  %vm283_vm5 = vcmp.eq.s32.totalorder %v282_v9, 1 }
  0x1c   : > { %v277_v8 = vld [vmem:[#allocation3] sm:$0xff] }
  0x97   : > { %v262_v4 = vpop.f32.mrf.mxu0 }
  0x98   : > { %v263_v6 = vadd.f32 %v443_v3, %v262_v4 }
  0x9a   : > { %v267_v7 = vadd.f32 %v266_v5, %v263_v6 }
  0x9c   : > { %vm268_vm2 = vcmp.ge.f32.partialorder %v267_v7, 1.0 }
  0x9d   : > { %v404_v11 = vsel %vm268_vm2, 1.0, %v501_v10 }
  0x9e   : > { %v271_v12 = vsub.f32 %v267_v7, %v404_v11  ;;  %v274_v13 = vpack.c.bf16 %v404_v11, %v404_v11  ;;  %v278_v14 = vadd.f32 %v404_v11, %v277_v8 }
  0x9f   : > { %v264_v15 = vpop.f32.mrf.mxu0 }
  0xa0   : > { %273 = vst.msk [vmem:[#allocation2] sm:$0xff] %vm272_vm3, %v271_v12  ;;  %v280_v16 = vmul.f32 0.25, %v278_v14 }
  0xa1   : > { %276 = vst.msk [vmem:[%s557_s27] sm:$0xf] %vm275_vm4, %v274_v13 }
  0xa2   : > { %v284_v17 = vsel %vm283_vm5, %v280_v16, %v278_v14 }
  0xa3   : > { %285 = vst.msk [vmem:[#allocation3] sm:$0xff] %vm272_vm3, %v284_v17 }
  0xa4   : > { %411 = dma.vmem_to_hbm [thread:$0]  (%p414_p7), %s305_s8, 128, %s307_s11, [#allocation4]  }
  0xa5   : > { %485 = dma.done.wait (%p414_p7), [#allocation4], 128  }
  0xa6   : > { %487 = vsyncadd (%p414_p7), [#allocation4], 4294967168 }
  0xa7 PF: > { %s16_s17 = sadd.s32 1, %s498_s17   ;;  %s589_s15 = smov %s494_s16 }
  0xa8   : > { %p13_p8 = scmp.ge.s32.totalorder %s16_s17, 6   ;;  %s590_s16 = smov %s592_s19 }
  0xaa   :  { %15 = sbr.rel (!%p13_p8) target bundleno = 2 (0x2), region = 76 }
  0xaf   :  { %330 = vsyncpa [#allocation4], 1 }
  0xb0   :  { %332 = vsyncpa [#allocation4 + $0x1], 1 }

// kernel: _lambda_.13
= control target key start
LH: loop header
LB: loop body
LE: loop exit
PB: predicated region body
PF: predicated region fallthrough
CT: control target
= control target key end

     0   :  { %s513_s15 = smov 0   ;;  %s515_s16 = smov 0   ;;  %s576_s0 = inlined_call_operand.vmem [shape: bf16[4,8,36], index: 0, kind: input, shape index: {}]   ;;  %s577_s1 = inlined_call_operand.vmem [shape: bf16[36,16], index: 1, kind: input, shape index: {}]   ;;  %s578_s2 = inlined_call_operand.vmem [shape: f32[1,16], index: 2, kind: input, shape index: {}]   ;;  %s579_s3 = inlined_call_operand.vmem [shape: bf16[4,8,16], index: 3, kind: output, shape index: {0}]   ;;  %s580_s4 = inlined_call_operand.vmem [shape: f32[8,16], index: 4, kind: output, shape index: {1}]  }
   0x1   :  { %s517_s17 = smov 0  }
   0x2 LB: > { %s24_s18 = sadd.s32 1, %s480_s16  ;;  %p416_p0 = scmp.ge.s32.totalorder %s484_s17, 1  ;;  %s484_s17 = sphi %s517_s17, %s15_s17   ;;  %s480_s16 = sphi %s515_s16, %s582_s16   ;;  %s476_s15 = sphi %s513_s15, %s581_s15  }
   0x3   : > { %p25_p1 = scmp.ge.s32.totalorder %s24_s18, 4  ;;  %p183_p2 = scmp.lt.s32.totalorder %s484_s17, 5 }
   0x5   : > { %s584_s18 = smov (%p25_p1, %s24_s18), 0  ;;  %p184_p3 = pnand %p416_p0, %p183_p2 }
   0x6   : > { %p217_p4 = scmp.lt.s32.totalorder (!%p184_p3), %s476_s15, 3  ;;  %p419_p5 = scmp.ne.s32.totalorder (!%p184_p3), %s476_s15, 0 }
   0x7   : > { %187 = sbr.rel (%p184_p3) target bundleno = 176 (0xb0), region = 32 }
   0xc   : > { %s218_s19 = scalar_select %p217_p4, %s476_s15, 3 }
   0xd   : > { %239 = sbr.rel (%p419_p5) target bundleno = 21 (0x15), region = 36 }
   0xe   : > { %s417_s20 = sshll.u32 %s218_s19, 2 }
   0xf   : > { %s223_s23 = scalar_lea.vmem %s576_s0, %s417_s20  ;;  %s541_s26 = scalar_lea.vmem %s579_s3, %s417_s20 }
  0x12   : > { %vm240_vm0 = vcmask 130048   ;;  %v486_v0 = vmov 0.0  }
  0x13   : > { %241 = vst.msk [vmem:[#allocation2] sm:$0xff] %vm240_vm0, %v486_v0 }
  0x14   : > { %242 = vst.msk [vmem:[%s580_s4] sm:$0xff] %vm240_vm0, %v486_v0 }
  0x15 PF: > { %v248_v1 = vld [vmem:[%s577_s1 + $0x10] sm:$0x3]  ;;  %vm272_vm1 = vcmask 1041408   ;;  %v434_v5 = vld [vmem:[%s577_s1 + $0x8] sm:$0xff]  ;;  %v433_v6 = vld [vmem:[%s577_s1] sm:$0xff]  ;;  %vm268_vm2 = vcmask 293888  }
  0x16   : > { %v262_v2 = vunpack.c.l.b16 %v248_v1  ;;  %v243_v7 = vld [vmem:[%s223_s23] sm:$0xf]  ;;  %p302_p6 = scmp.eq.s32.totalorder %s476_s15, 3  ;;  %v487_v15 = vmov 0.0   ;;  %vm295_vm4 = vcmask 130048   ;;  %vm298_vm5 = vcmask 125952  }
  0x17   : > { %v461_v8 = vld [vmem:[%s578_s2] ss:$0 sm:$0xff] }
  0x18   : > { %v265_v3 = vpack.c.b16 %v262_v2, %v262_v2  ;;  %s304_s11 = scalar_select %p302_p6, 1, 0 }
  0x1a   : > { %v274_v4 = vsel %vm272_vm1, %v265_v3, 0  ;;  %v289_v10 = vld [vmem:[#allocation2] sm:$0xff]  ;;  %v305_v14 = vstv %s304_s11 }
  0x1b   : > { %281 = vmatpush.bf16.msra.mxu0 %v274_v4  ;;  %v300_v13 = vld [vmem:[%s580_s4] sm:$0xff]  ;;  %vm306_vm6 = vcmp.eq.s32.totalorder %v305_v14, 1 }
  0x1f   : > { %282 = vmatpush.bf16.msra.mxu0 %v434_v5 }
  0x23   : > { %283 = vmatpush.bf16.msra.mxu0 %v433_v6 }
  0x26   : > { %428 = vmatmul.msk.bf16.vlgmr.msra.gmra.mxu0 %vm268_vm2, %v243_v7 }
  0xa3   : > { %v285_v9 = vpop.f32.mrf.mxu0 }
  0xa4   : > { %v286_v11 = vadd.f32 %v461_v8, %v285_v9 }
  0xa6   : > { %v290_v12 = vadd.f32 %v289_v10, %v286_v11 }
  0xa8   : > { %vm291_vm3 = vcmp.ge.f32.partialorder %v290_v12, 1.0 }
  0xa9   : > { %v429_v16 = vsel %vm291_vm3, 1.0, %v487_v15 }
  0xaa   : > { %v294_v17 = vsub.f32 %v290_v12, %v429_v16  ;;  %v297_v18 = vpack.c.bf16 %v429_v16, %v429_v16  ;;  %v301_v19 = vadd.f32 %v429_v16, %v300_v13 }
  0xab   : > { %v287_v20 = vpop.f32.mrf.mxu0 }
  0xac   : > { %296 = vst.msk [vmem:[#allocation2] sm:$0xff] %vm295_vm4, %v294_v17  ;;  %v303_v21 = vmul.f32 0.25, %v301_v19 }
  0xad   : > { %299 = vst.msk [vmem:[%s541_s26] sm:$0xf] %vm298_vm5, %v297_v18 }
  0xae   : > { %v307_v22 = vsel %vm306_vm6, %v303_v21, %v301_v19 }
  0xaf   : > { %308 = vst.msk [vmem:[%s580_s4] sm:$0xff] %vm295_vm4, %v307_v22 }
  0xb0 PF: > { %s15_s17 = sadd.s32 1, %s484_s17   ;;  %s581_s15 = smov %s480_s16 }
  0xb1   : > { %p12_p7 = scmp.ge.s32.totalorder %s15_s17, 6   ;;  %s582_s16 = smov %s584_s18 }
  0xb3   :  { %14 = sbr.rel (!%p12_p7) target bundleno = 2 (0x2), region = 78 }

// kernel: _lambda_.15
= control target key start
LH: loop header
LB: loop body
LE: loop exit
PB: predicated region body
PF: predicated region fallthrough
CT: control target
= control target key end

     0   :  { %10 = vsyncpa [#allocation4], 0  ;;  %s783_s0 = inlined_call_operand.vmem [shape: bf16[4,8,72], index: 0, kind: input, shape index: {}]   ;;  %s784_s1 = inlined_call_operand.vmem [shape: bf16[72,16], index: 1, kind: input, shape index: {}]   ;;  %s785_s2 = inlined_call_operand.vmem [shape: f32[1,16], index: 2, kind: input, shape index: {}]   ;;  %s786_s3 = inlined_call_operand.hbm [shape: bf16[4,8,16], index: 3, kind: output, shape index: {0}]   ;;  %s787_s4 = inlined_call_operand.vmem [shape: f32[8,16], index: 4, kind: output, shape index: {1}]  }
   0x1   :  { %12 = vsyncpa [#allocation4 + $0x1], 0  ;;  %s635_s15 = smov 0   ;;  %s637_s16 = smov 0  }
   0x2   :  { %s639_s17 = smov 0   ;;  %s641_s18 = smov 0  }
   0x3   :  { %s643_s19 = smov 0   ;;  %s645_s20 = smov 0  }
   0x4 LB: > { %s435_s21 = sadd.s32 4294967295, %s606_s20   ;;  %s436_s22 = sadd.s32 4294967294, %s606_s20   ;;  %s606_s20 = sphi %s645_s20, %s18_s20   ;;  %s602_s19 = sphi %s643_s19, %s796_s19   ;;  %s598_s18 = sphi %s641_s18, %s795_s18   ;;  %s594_s17 = sphi %s639_s17, %s794_s17   ;;  %s590_s16 = sphi %s637_s16, %s793_s16   ;;  %s586_s15 = sphi %s635_s15, %s792_s15  }
   0x5   : > { %s27_s23 = sadd.s32 1, %s602_s19  ;;  %s109_s24 = sadd.s32 1, %s594_s17 }
   0x6   : > { %p28_p0 = scmp.ge.s32.totalorder %s27_s23, 4  ;;  %p119_p1 = scmp.ne.s32.totalorder %s594_s17, %s590_s16 }
   0x7   : > { %p120_p2 = scmp.eq.s32.totalorder %s435_s21, 3  ;;  %p125_p3 = scmp.ne.s32.totalorder %s590_s16, %s586_s15 }
   0x8   : > { %s798_s23 = smov (%p28_p0, %s27_s23), 0  ;;  %p126_p5 = scmp.eq.s32.totalorder %s436_s22, 3 }
   0x9   : > { %p675_p4 = por %p120_p2, %p119_p1  ;;  %s104_s26 = ssub.s32 %s602_s19, %s798_s23 }
   0xa   : > { %p439_p6 = scmp.ge.s32.totalorder %s606_s20, 1  ;;  %p107_p7 = scmp.eq.s32.totalorder %s104_s26, 0 }
   0xb   : > { %p682_p8 = por %p126_p5, %p125_p3  ;;  %p186_p9 = scmp.lt.s32.totalorder %s606_s20, 5 }
   0xc   : > { %s688_s28 = scalar_select %p107_p7, %s594_s17, %s109_s24  }
   0xd   : > { %p187_p10 = pnand %p439_p6, %p186_p9 }
   0xe   : > { %s209_s29 = sand.u32 (!%p187_p10), 1, %s590_s16   ;;  %p218_p11 = scmp.lt.s32.totalorder (!%p187_p10), %s598_s18, 3 }
   0xf   : > { %190 = sbr.rel (%p187_p10) target bundleno = 193 (0xc1), region = 32  ;;  %s694_s30 = sshll.u32 (!%p187_p10), %s209_s29, 2 }
  0x10   : > { %s211_s10 = scalar_lea.vmem (!%p187_p10), [#allocation3], %s694_s30  ;;  %p442_p12 = scmp.ne.s32.totalorder (!%p187_p10), %s598_s18, 0 }
  0x14   : > { %s219_s5 = scalar_select %p218_p11, %s598_s18, 3 }
  0x15   : > { %233 = sbr.rel (%p442_p12) target bundleno = 29 (0x1d), region = 36 }
  0x16   : > { %s441_s6 = sshll.u32 %s219_s5, 2 }
  0x17   : > { %s224_s9 = scalar_lea.vmem %s783_s0, %s441_s6 }
  0x1a   : > { %vm234_vm0 = vcmask 130048   ;;  %v608_v0 = vmov 0.0  }
  0x1b   : > { %235 = vst.msk [vmem:[#allocation2] sm:$0xff] %vm234_vm0, %v608_v0 }
  0x1c   : > { %236 = vst.msk [vmem:[%s787_s4] sm:$0xff] %vm234_vm0, %v608_v0 }
  0x1d PF: > { %v246_v1 = vld [vmem:[%s784_s1 + $0x20] sm:$0xf]  ;;  %vm282_vm1 = vcmask 1043456   ;;  %v469_v5 = vld [vmem:[%s784_s1 + $0x18] sm:$0xff]  ;;  %v468_v6 = vld [vmem:[%s784_s1 + $0x10] sm:$0xff]  ;;  %vm278_vm2 = vcmask 588800  }
  0x1e   : > { %v268_v2 = vunpack.c.l.b16 %v246_v1  ;;  %v467_v7 = vld [vmem:[%s784_s1 + $0x8] sm:$0xff]  ;;  %v466_v8 = vld [vmem:[%s784_s1] sm:$0xff]  ;;  %p312_p13 = scmp.eq.s32.totalorder %s598_s18, 3  ;;  %s462_s13 = sshll.u32 %s598_s18, 2  ;;  %v609_v17 = vmov 0.0   ;;  %vm305_vm4 = vcmask 130048  }
  0x1f   : > { %v237_v9 = vld [vmem:[%s224_s9] sm:$0xf]  ;;  %s335_s24 = scalar_lea.hbm %s786_s3, %s462_s13  ;;  %s733_s9 = sshll.u32 %s211_s10, 4  ;;  %vm308_vm5 = vcmask 125952   ;;  %s338_s9 = int_to_ptr.vmem [resolvable:$true] %s733_s9 }
  0x20   : > { %v273_v3 = vpack.c.b16 %v268_v2, %v268_v2  ;;  %v527_v10 = vld [vmem:[%s785_s2] ss:$0 sm:$0xff]  ;;  %s314_s14 = scalar_select %p312_p13, 1, 0 }
  0x21   : > { %s339_s18 = sshll.u32 %s335_s24, 4  ;;  %s320_s6 = scalar_lea.sflag [#allocation4], %s209_s29  ;;  %s340_s18 = int_to_ptr.hbm [resolvable:$true] %s339_s18 }
  0x22   : > { %v284_v4 = vsel %vm282_vm1, %v273_v3, 0  ;;  %v299_v12 = vld [vmem:[#allocation2] sm:$0xff]  ;;  %v315_v16 = vstv %s314_s14  ;;  %s542_s7 = sshra.s32 %s340_s18, 4  ;;  %s548_s13 = scalar_lea.hbm %s786_s3, 16  ;;  %s543_s7 = int_to_ptr.hbm [resolvable:$true] %s542_s7 }
  0x23   : > { %289 = vmatpush.bf16.msra.mxu0 %v284_v4  ;;  %v310_v15 = vld [vmem:[%s787_s4] sm:$0xff]  ;;  %vm735_vm6 = vcmp.eq.s32.totalorder %v315_v16, 1  ;;  %s544_s8 = scalar_lea.hbm %s543_s7, 4  ;;  %p549_p3 = scmp.lt.s32.totalorder %s543_s7, %s786_s3 }
  0x24   : > { %p545_p0 = scmp.ne.s32.totalorder %s543_s7, %s544_s8  ;;  %p550_p5 = scmp.lt.s32.totalorder %s548_s13, %s544_s8 }
  0x26   : > { %p546_p1 = pnand %p545_p0, %p675_p4  ;;  %p551_p6 = por %p550_p5, %p549_p3 }
  0x27   : > { %290 = vmatpush.bf16.msra.mxu0 %v469_v5 }
  0x28   : > { %p547_p2 = pneg %p546_p1 }
  0x2a   : > { %p552_p7 = pnand %p551_p6, %p547_p2 }
  0x2b   : > { %291 = vmatpush.bf16.msra.mxu0 %v468_v6 }
  0x2f   : > { %292 = vmatpush.bf16.msra.mxu0 %v467_v7 }
  0x33   : > { %293 = vmatpush.bf16.msra.mxu0 %v466_v8 }
  0x36   : > { %459 = vmatmul.msk.bf16.vlgmr.msra.gmra.mxu0 %vm278_vm2, %v237_v9 }
  0xb3   : > { %v295_v11 = vpop.f32.mrf.mxu0 }
  0xb4   : > { %v296_v13 = vadd.f32 %v527_v10, %v295_v11 }
  0xb6   : > { %v300_v14 = vadd.f32 %v299_v12, %v296_v13 }
  0xb8   : > { %vm301_vm3 = vcmp.ge.f32.partialorder %v300_v14, 1.0 }
  0xb9   : > { %v460_v18 = vsel %vm301_vm3, 1.0, %v609_v17 }
  0xba   : > { %v304_v19 = vsub.f32 %v300_v14, %v460_v18  ;;  %v311_v20 = vadd.f32 %v460_v18, %v310_v15  ;;  %v307_v21 = vpack.c.bf16 %v460_v18, %v460_v18 }
  0xbb   : > { %v297_v23 = vpop.f32.mrf.mxu0 }
  0xbc   : > { %306 = vst.msk [vmem:[#allocation2] sm:$0xff] %vm305_vm4, %v304_v19  ;;  %v313_v24 = vmul.f32 0.25, %v311_v20 }
  0xbd   : > { %309 = vst.msk [vmem:[%s211_s10] sm:$0xf] %vm308_vm5, %v307_v21 }
  0xbe   : > { %v317_v25 = vsel %vm735_vm6, %v313_v24, %v311_v20 }
  0xbf   : > { %555 = shalt.err (!%p552_p7)
}
  0xc0   : > { %470 = dma.vmem_to_hbm [thread:$0]  (%p675_p4), %s338_s9, 64, %s340_s18, %s320_s6   ;;  %318 = vst.msk [vmem:[%s787_s4] sm:$0xff] %vm305_vm4, %v317_v25 }
  0xc1 PF: > { %p476_p9 = scmp.ge.s32.totalorder %s606_s20, 2  ;;  %s361_s10 = sand.u32 1, %s586_s15  }
  0xc2   : > { %s362_s22 = scalar_lea.sflag [#allocation4], %s361_s10 }
  0xc3   : > { %p473_p10 = pnand %p476_p9, %p682_p8 }
  0xc5   : > { %p474_p11 = pneg %p473_p10 }
  0xc7   : > { %581 = dma.done.wait (%p474_p11), %s362_s22, 64  }
  0xc8   : > { %583 = vsyncadd (%p474_p11), %s362_s22, 4294967232  ;;  %s18_s20 = sadd.s32 1, %s606_s20   ;;  %s792_s15 = smov %s590_s16 }
  0xc9   : > { %p15_p4 = scmp.ge.s32.totalorder %s18_s20, 6   ;;  %s793_s16 = smov %s594_s17 }
  0xca   : > { %s794_s17 = smov %s688_s28  ;;  %s795_s18 = smov %s602_s19 }
  0xcb   : > { %s796_s19 = smov %s798_s23  ;;  %17 = sbr.rel (!%p15_p4) target bundleno = 4 (0x4), region = 83 }
  0xd0   :  { %368 = vsyncpa [#allocation4], 1 }
  0xd1   :  { %370 = vsyncpa [#allocation4 + $0x1], 1 }

</bundles_post_ra>
